<compile_context>
chip_gen: v7x
topology: tpu7x:2x2x1
jax: 0.10.0
libtpu: 0.0.40
codegen_flags: <defaults>
</compile_context>

<pallas_src>
import functools

import numpy as np
import jax
import jax.numpy as jnp
from jax.experimental import pallas as pl
from jax.experimental.pallas import tpu as pltpu


# ----------------------------------------------------------------------------
# Configuration (mirrors what `configer` would provide)
# ----------------------------------------------------------------------------
TEMPERATURE = 0.1
BASE_TEMPERATURE = 0.07
IGNORE_LABEL = -1
MAX_SAMPLES = 128
MAX_VIEWS = 16

MAX_N = MAX_SAMPLES       # anchor_num * n_view <= max_samples  ->  at most 128 rows
LANE = 128                # TPU lane width
PAD_LABEL = -2            # sentinel class id for padded rows (real ids are >= 0)
NEG_BIG = -1e30


# ----------------------------------------------------------------------------
# Pallas kernel: the `_contrastive` hot path on a static (MAX_N, MAX_N) tile
# ----------------------------------------------------------------------------
def _contrastive_kernel(n_ref, f_ref, ft_ref, lab_col_ref, lab_row_ref, out_ref, *,
                        inv_temperature, loss_scale):
    # n_ref:       (1,)            int32  SMEM  number of valid rows (<= MAX_N)
    # f_ref:       (MAX_N, DPAD)   bf16   VMEM  features (rows >= n hold a real row 0 copy)
    # ft_ref:      (DPAD, MAX_N)   bf16   VMEM  pre-transposed features (no in-kernel vxpose)
    # lab_col_ref: (MAX_N, 1)      int32  VMEM  per-row class id (PAD_LABEL if padded)
    # lab_row_ref: (1, MAX_N)      int32  VMEM  same labels, lane-major
    # out_ref:     (1, 1)          f32    VMEM  scalar loss
    n = n_ref[0]
    f = f_ref[...]
    ft = ft_ref[...]
    lab_col = lab_col_ref[...]                                    # (MAX_N, 1)
    lab_row = lab_row_ref[...]                                    # (1, MAX_N)
    max_n = f.shape[0]

    # Plain (M,K)x(K,N) contraction on the MXU, bf16 feed, f32 accumulation.
    raw = jnp.dot(f, ft, preferred_element_type=jnp.float32)      # (MAX_N, MAX_N) f32

    col_i = jax.lax.broadcasted_iota(jnp.int32, (1, max_n), 1)    # (1, MAX_N)
    row_i = jax.lax.broadcasted_iota(jnp.int32, (max_n, 1), 0)    # (MAX_N, 1)
    col_valid = col_i < n                                         # (1, MAX_N) bool

    # Single masking pass: scale by 1/temperature and kill invalid columns.
    logits = jnp.where(col_valid, raw * inv_temperature, jnp.float32(NEG_BIG))
    logits_max = jnp.max(logits, axis=1, keepdims=True)           # (MAX_N, 1)
    logits = logits - logits_max                                  # invalid cols stay ~ -1e30

    exp_l = jnp.exp(logits)                                       # exactly 0 for invalid cols
    same_class = lab_col == lab_row                               # (MAX_N, MAX_N) bool

    row_sum = jnp.sum(exp_l, axis=1, keepdims=True)
    same_sum = jnp.sum(jnp.where(same_class, exp_l, 0.0), axis=1, keepdims=True)
    neg_logits = row_sum - same_sum      # == rowsum(exp_logits * (1 - same_class_mask))

    # HRNet per-element denominator (kept on purpose; see header note).
    log_prob = logits - jnp.log(exp_l + neg_logits)

    # positive predicate: same class, not self, valid column (never a f32 mask tile)
    pos_pred = same_class & (row_i != col_i) & col_valid
    mask_sum = jnp.sum(jnp.where(pos_pred, 1.0, 0.0), axis=1, keepdims=True)
    pos_sum = jnp.sum(jnp.where(pos_pred, log_prob, 0.0), axis=1, keepdims=True)

    # Guard the 0/0 of padded rows (and of the degenerate n_view == 1 case,
    # which would produce NaN in the PyTorch reference).
    mean_log_prob_pos = jnp.where(mask_sum > 0.0,
                                  pos_sum / jnp.maximum(mask_sum, 1.0), 0.0)

    loss_rows = (-loss_scale) * mean_log_prob_pos                 # (MAX_N, 1)

    # Zero padded rows explicitly and average over the n valid rows only.
    loss_rows = jnp.where(row_i < n, loss_rows, 0.0)
    out_ref[...] = jnp.sum(loss_rows, keepdims=True) / n.astype(jnp.float32)


def _build_contrastive_call(temperature, base_temperature):
    kernel = functools.partial(
        _contrastive_kernel,
        inv_temperature=float(1.0 / temperature),
        loss_scale=float(temperature / base_temperature))
    return pl.pallas_call(
        kernel,
        out_shape=jax.ShapeDtypeStruct((1, 1), jnp.float32),
        in_specs=[
            pl.BlockSpec(memory_space=pltpu.MemorySpace.SMEM),   # n_valid (1,)
            pl.BlockSpec(memory_space=pltpu.MemorySpace.VMEM),   # features (N, DPAD)
            pl.BlockSpec(memory_space=pltpu.MemorySpace.VMEM),   # features^T (DPAD, N)
            pl.BlockSpec(memory_space=pltpu.MemorySpace.VMEM),   # labels (N, 1)
            pl.BlockSpec(memory_space=pltpu.MemorySpace.VMEM),   # labels (1, N)
        ],
        out_specs=pl.BlockSpec(memory_space=pltpu.MemorySpace.VMEM),
    )


def contrastive_loss_pallas(contrast_feature, tiled_labels, n_valid,
                            temperature=TEMPERATURE,
                            base_temperature=BASE_TEMPERATURE):
    """contrast_feature: (MAX_N, C); tiled_labels: (MAX_N,) int32 (PAD_LABEL for
    padded rows); n_valid: int32 of shape (1,). Returns the scalar loss."""
    max_n, c = contrast_feature.shape
    dpad = max(LANE, pl.cdiv(c, LANE) * LANE)
    f = jnp.asarray(contrast_feature, jnp.float32)
    if dpad != c:
        f = jnp.pad(f, ((0, 0), (0, dpad - c)))    # zero columns don't change dots
    f_bf = f.astype(jnp.bfloat16)                  # halves the feature DMA
    f_t = f_bf.T                                   # tiny (~32 KiB) XLA transpose
    lab = jnp.asarray(tiled_labels, jnp.int32)
    lab_col = lab.reshape(max_n, 1)
    lab_row = lab.reshape(1, max_n)
    n_arr = jnp.asarray(n_valid, jnp.int32).reshape(1)
    out = _build_contrastive_call(temperature, base_temperature)(
        n_arr, f_bf, f_t, lab_col, lab_row)
    return out[0, 0]


@jax.jit
def _gather_and_contrast(feats_nchw, flat_b, flat_p, labels_pad, n_arr):
    # Device-side gather of the sampled pixels straight from the NCHW view:
    # no full feature-map transpose, only ~MAX_N*C elements touched in HBM.
    B, C, H, W = feats_nchw.shape
    feats_r = feats_nchw.reshape(B, C, H * W)
    cf = feats_r[flat_b, :, flat_p]                # (MAX_N, C)
    return contrastive_loss_pallas(cf, labels_pad, n_arr)


# ----------------------------------------------------------------------------
# Host-side glue: label resize + hard anchor sampling -> fixed-size gather idx
# ----------------------------------------------------------------------------
def _nearest_resize_np(x, out_h, out_w):
    """PyTorch F.interpolate(mode='nearest') on an int map, host-side."""
    b, in_h, in_w = x.shape
    ri = np.floor(np.arange(out_h) * (in_h / out_h)).astype(np.int64)
    ci = np.floor(np.arange(out_w) * (in_w / out_w)).astype(np.int64)
    return x[:, ri[:, None], ci[None, :]]


# TODO(synk): _hard_anchor_sampling uses torch.unique/nonzero/randperm with
# runtime-dependent shapes; no clean static-shape Pallas equivalent, so it runs
# host-side on the small int label/prediction maps and only returns MAX_N-sized
# gather indices (the features themselves stay on device).  In a real training
# loop this D2H + host work should be overlapped with the previous step.
def _hard_anchor_sampling_indices(y_hat, y, rng,
                                  ignore_label=IGNORE_LABEL,
                                  max_samples=MAX_SAMPLES,
                                  max_views=MAX_VIEWS,
                                  max_n=MAX_N):
    y_hat = np.asarray(y_hat)
    y = np.asarray(y)
    batch_size = y_hat.shape[0]

    classes = []
    total_classes = 0
    for ii in range(batch_size):
        this_y = y_hat[ii]
        this_classes = np.unique(this_y)
        this_classes = [c for c in this_classes if c != ignore_label]
        this_classes = [c for c in this_classes if (this_y == c).sum() > max_views]
        classes.append(this_classes)
        total_classes += len(this_classes)

    if total_classes == 0:
        return None

    n_view = min(max_samples // total_classes, max_views)
    if n_view == 0:          # degenerate (would yield empty tensors / NaN in torch)
        return None

    b_idx = np.zeros((total_classes, n_view), np.int32)
    p_idx = np.zeros((total_classes, n_view), np.int32)
    y_ = np.zeros((total_classes,), np.int32)
    ptr = 0
    for ii in range(batch_size):
        this_y_hat = y_hat[ii]
        this_y = y[ii]
        for cls_id in classes[ii]:
            hard = np.nonzero((this_y_hat == cls_id) & (this_y != cls_id))[0]
            easy = np.nonzero((this_y_hat == cls_id) & (this_y == cls_id))[0]
            num_hard, num_easy = len(hard), len(easy)

            if num_hard >= n_view / 2 and num_easy >= n_view / 2:
                num_hard_keep = n_view // 2
                num_easy_keep = n_view - num_hard_keep
            elif num_hard >= n_view / 2:
                num_easy_keep = num_easy
                num_hard_keep = n_view - num_easy_keep
            elif num_easy >= n_view / 2:
                num_hard_keep = num_hard
                num_easy_keep = n_view - num_hard_keep
            else:
                raise Exception("this should never be touched!")

            hard = hard[rng.permutation(num_hard)[:num_hard_keep]]
            easy = easy[rng.permutation(num_easy)[:num_easy_keep]]
            indices = np.concatenate([hard, easy], axis=0)
            b_idx[ptr] = ii
            p_idx[ptr] = indices
            y_[ptr] = int(cls_id)
            ptr += 1

    # contrast_feature = cat(unbind(X_, dim=1), dim=0): flat row r = v*A + a
    n_valid = total_classes * n_view
    assert n_valid <= max_n
    flat_b = np.zeros((max_n,), np.int32)
    flat_p = np.zeros((max_n,), np.int32)
    labels_pad = np.full((max_n,), PAD_LABEL, np.int32)
    flat_b[:n_valid] = np.transpose(b_idx, (1, 0)).reshape(-1)
    flat_p[:n_valid] = np.transpose(p_idx, (1, 0)).reshape(-1)
    labels_pad[:n_valid] = np.tile(y_, n_view)    # mask.repeat == labels tiled n_view x
    return flat_b, flat_p, labels_pad, n_valid


# ----------------------------------------------------------------------------
# Forward pass (mirrors PixelContrastLoss.forward)
# ----------------------------------------------------------------------------
def pixel_contrast_loss(feats, labels, predict, rng):
    """feats: (B, C, H, W) f32 NCHW; labels/predict: (B, Hl, Wl) / (B, H, W) int32."""
    B, C, H, W = feats.shape

    # labels.unsqueeze(1).float() -> nearest interpolate to feats spatial size,
    # done host-side in numpy on the tiny int map (nearest on floats == nearest on ints).
    labels_np = np.asarray(labels)
    predict_np = np.asarray(predict)
    labels_r = _nearest_resize_np(labels_np, H, W)

    labels_flat = labels_r.reshape(B, -1)                          # (B, HW)
    predict_flat = predict_np.reshape(B, -1)                       # (B, HW)

    sampled = _hard_anchor_sampling_indices(labels_flat, predict_flat, rng)
    if sampled is None:
        return jnp.float32(0.0)    # torch would crash on None; return 0 loss
    flat_b, flat_p, labels_pad, n_valid = sampled

    return _gather_and_contrast(feats,
                                jnp.asarray(flat_b), jnp.asarray(flat_p),
                                jnp.asarray(labels_pad),
                                jnp.asarray([n_valid], jnp.int32))


# ----------------------------------------------------------------------------
# NumPy reference of _contrastive (mirrors the kernel's bf16 matmul feed)
# ----------------------------------------------------------------------------
def _bf16_round(x):
    x32 = jnp.asarray(np.asarray(x, np.float32))
    return np.asarray(x32.astype(jnp.bfloat16).astype(jnp.float32)).astype(np.float64)


def _contrastive_ref(contrast_feature, tiled_labels,
                     temperature=TEMPERATURE, base_temperature=BASE_TEMPERATURE):
    f_bf = _bf16_round(contrast_feature)
    lab = np.asarray(tiled_labels, np.int64).reshape(-1, 1)
    N = f_bf.shape[0]
    logits = (f_bf @ f_bf.T) / temperature
    logits = logits - logits.max(axis=1, keepdims=True)
    mask = (lab == lab.T).astype(np.float64)
    neg_mask = 1.0 - mask
    mask = mask * (1.0 - np.eye(N))
    exp_logits = np.exp(logits)
    neg_logits = (exp_logits * neg_mask).sum(1, keepdims=True)
    log_prob = logits - np.log(exp_logits + neg_logits)
    mean_log_prob_pos = (mask * log_prob).sum(1) / mask.sum(1)
    return float((-(temperature / base_temperature) * mean_log_prob_pos).mean())


if __name__ == "__main__":
    key = jax.random.PRNGKey(0)
    k_f, k_l, k_p = jax.random.split(key, 3)

    B, C, H, W = 2, 32, 16, 16
    NUM_CLASSES = 3

    feats = jax.random.normal(k_f, (B, C, H, W), dtype=jnp.float32)
    # L2-normalize over channels (typical contrastive embedding input)
    feats = feats / jnp.linalg.norm(feats, axis=1, keepdims=True)

    labels = jax.random.randint(k_l, (B, H, W), 0, NUM_CLASSES, dtype=jnp.int32)
    predict = jax.random.randint(k_p, (B, H, W), 0, NUM_CLASSES, dtype=jnp.int32)

    rng = np.random.RandomState(0)
    loss = pixel_contrast_loss(feats, labels, predict, rng)
    loss = jax.block_until_ready(loss)

    # Reference check on the Pallas-implemented hot path (deterministic rng).
    rng_ref = np.random.RandomState(0)
    feats_nhwc = np.asarray(jnp.transpose(feats, (0, 2, 3, 1)).reshape(B, -1, C))
    labels_flat = np.asarray(labels).reshape(B, -1)
    predict_flat = np.asarray(predict).reshape(B, -1)
    flat_b, flat_p, labels_pad, n_valid = _hard_anchor_sampling_indices(
        labels_flat, predict_flat, rng_ref)
    cf = feats_nhwc[flat_b[:n_valid], flat_p[:n_valid], :]
    ref = _contrastive_ref(cf, labels_pad[:n_valid])

    assert np.isfinite(float(loss)), "loss is not finite"
    assert abs(float(loss) - ref) < 2e-3 * max(1.0, abs(ref)), (float(loss), ref)
    print("KERNEL_OK")
</pallas_src>

<mosaic_0001>
module attributes {stable_mosaic.version = 11 : i64} {
  func.func @_contrastive_kernel(%arg0: memref<1xi32, #tpu.memory_space<smem>>, %arg1: memref<128x128xbf16, #tpu.memory_space<vmem>>, %arg2: memref<128x128xbf16, #tpu.memory_space<vmem>>, %arg3: memref<128x1xi32, #tpu.memory_space<vmem>>, %arg4: memref<1x128xi32, #tpu.memory_space<vmem>>, %arg5: memref<1x1xf32, #tpu.memory_space<vmem>>) attributes {dimension_semantics = [], scalar_prefetch = 0 : i64, scratch_operands = 0 : i64, tpu.core_type = #tpu.core_type<tc>} {
    %c0 = arith.constant 0 : index
    %0 = memref.load %arg0[%c0] : memref<1xi32, #tpu.memory_space<smem>>
    %c0_0 = arith.constant 0 : index
    %c0_1 = arith.constant 0 : index
    %1 = vector.load %arg1[%c0_0, %c0_1] : memref<128x128xbf16, #tpu.memory_space<vmem>>, vector<128x128xbf16>
    %c0_2 = arith.constant 0 : index
    %c0_3 = arith.constant 0 : index
    %2 = vector.load %arg2[%c0_2, %c0_3] : memref<128x128xbf16, #tpu.memory_space<vmem>>, vector<128x128xbf16>
    %c0_4 = arith.constant 0 : index
    %c0_5 = arith.constant 0 : index
    %3 = vector.load %arg3[%c0_4, %c0_5] : memref<128x1xi32, #tpu.memory_space<vmem>>, vector<128x1xi32>
    %c0_6 = arith.constant 0 : index
    %c0_7 = arith.constant 0 : index
    %4 = vector.load %arg4[%c0_6, %c0_7] : memref<1x128xi32, #tpu.memory_space<vmem>>, vector<1x128xi32>
    %cst = arith.constant dense<0.000000e+00> : vector<128x128xf32>
    %5 = tpu.matmul %1, %2, %cst {dimension_numbers = #tpu.dot_dimension_numbers<[1], [0], [0], [1], [0, 0, 1, 1], [], []>} : vector<128x128xbf16>, vector<128x128xbf16>, vector<128x128xf32> -> vector<128x128xf32>
    %6 = tpu.iota {dimensions = array<i32: 1>} : vector<1x128xi32>
    %7 = tpu.iota {dimensions = array<i32: 0>} : vector<128x1xi32>
    %8 = vector.broadcast %0 : i32 to vector<1x128xi32>
    %9 = arith.cmpi slt, %6, %8 : vector<1x128xi32>
    %cst_8 = arith.constant 1.000000e+01 : f32
    %10 = vector.broadcast %cst_8 : f32 to vector<128x128xf32>
    %11 = arith.mulf %5, %10 : vector<128x128xf32>
    %cst_9 = arith.constant -1.000000e+30 : f32
    %12 = vector.shape_cast %9 : vector<1x128xi1> to vector<1x128xi1>
    %13 = vector.broadcast %12 : vector<1x128xi1> to vector<128x128xi1>
    %14 = vector.broadcast %cst_9 : f32 to vector<128x128xf32>
    %15 = arith.select %13, %11, %14 : vector<128x128xi1>, vector<128x128xf32>
    %cst_10 = arith.constant dense<0xFF800000> : vector<128xf32>
    %16 = vector.multi_reduction <maximumf>, %15, %cst_10 [1] : vector<128x128xf32> to vector<128xf32>
    %17 = vector.shape_cast %16 : vector<128xf32> to vector<128x1xf32>
    %18 = vector.broadcast %17 : vector<128x1xf32> to vector<128x128xf32>
    %19 = arith.subf %15, %18 : vector<128x128xf32>
    %20 = math.exp %19 : vector<128x128xf32>
    %21 = vector.broadcast %3 : vector<128x1xi32> to vector<128x128xi32>
    %22 = vector.broadcast %4 : vector<1x128xi32> to vector<128x128xi32>
    %23 = arith.cmpi eq, %21, %22 : vector<128x128xi32>
    %cst_11 = arith.constant dense<0.000000e+00> : vector<128xf32>
    %24 = vector.multi_reduction <add>, %20, %cst_11 [1] : vector<128x128xf32> to vector<128xf32>
    %25 = vector.shape_cast %24 : vector<128xf32> to vector<128x1xf32>
    %cst_12 = arith.constant 0.000000e+00 : f32
    %26 = vector.broadcast %cst_12 : f32 to vector<128x128xf32>
    %27 = arith.select %23, %20, %26 : vector<128x128xi1>, vector<128x128xf32>
    %cst_13 = arith.constant dense<0.000000e+00> : vector<128xf32>
    %28 = vector.multi_reduction <add>, %27, %cst_13 [1] : vector<128x128xf32> to vector<128xf32>
    %29 = vector.shape_cast %28 : vector<128xf32> to vector<128x1xf32>
    %30 = arith.subf %25, %29 : vector<128x1xf32>
    %31 = vector.broadcast %30 : vector<128x1xf32> to vector<128x128xf32>
    %32 = arith.addf %20, %31 : vector<128x128xf32>
    %33 = math.log %32 : vector<128x128xf32>
    %34 = arith.subf %19, %33 : vector<128x128xf32>
    %35 = vector.broadcast %7 : vector<128x1xi32> to vector<128x128xi32>
    %36 = vector.broadcast %6 : vector<1x128xi32> to vector<128x128xi32>
    %37 = arith.cmpi ne, %35, %36 : vector<128x128xi32>
    %38 = arith.andi %23, %37 : vector<128x128xi1>
    %39 = vector.broadcast %9 : vector<1x128xi1> to vector<128x128xi1>
    %40 = arith.andi %38, %39 : vector<128x128xi1>
    %cst_14 = arith.constant 1.000000e+00 : f32
    %cst_15 = arith.constant 0.000000e+00 : f32
    %41 = vector.broadcast %cst_14 : f32 to vector<128x128xf32>
    %42 = vector.broadcast %cst_15 : f32 to vector<128x128xf32>
    %43 = arith.select %40, %41, %42 : vector<128x128xi1>, vector<128x128xf32>
    %cst_16 = arith.constant dense<0.000000e+00> : vector<128xf32>
    %44 = vector.multi_reduction <add>, %43, %cst_16 [1] : vector<128x128xf32> to vector<128xf32>
    %45 = vector.shape_cast %44 : vector<128xf32> to vector<128x1xf32>
    %cst_17 = arith.constant 0.000000e+00 : f32
    %46 = vector.broadcast %cst_17 : f32 to vector<128x128xf32>
    %47 = arith.select %40, %34, %46 : vector<128x128xi1>, vector<128x128xf32>
    %cst_18 = arith.constant dense<0.000000e+00> : vector<128xf32>
    %48 = vector.multi_reduction <add>, %47, %cst_18 [1] : vector<128x128xf32> to vector<128xf32>
    %49 = vector.shape_cast %48 : vector<128xf32> to vector<128x1xf32>
    %cst_19 = arith.constant 0.000000e+00 : f32
    %50 = vector.broadcast %cst_19 : f32 to vector<128x1xf32>
    %51 = arith.cmpf ogt, %45, %50 : vector<128x1xf32>
    %cst_20 = arith.constant 1.000000e+00 : f32
    %52 = vector.broadcast %cst_20 : f32 to vector<128x1xf32>
    %53 = arith.maximumf %45, %52 : vector<128x1xf32>
    %54 = arith.divf %49, %53 : vector<128x1xf32>
    %cst_21 = arith.constant 0.000000e+00 : f32
    %55 = vector.broadcast %cst_21 : f32 to vector<128x1xf32>
    %56 = arith.select %51, %54, %55 : vector<128x1xi1>, vector<128x1xf32>
    %cst_22 = arith.constant -1.42857146 : f32
    %57 = vector.broadcast %cst_22 : f32 to vector<128x1xf32>
    %58 = arith.mulf %57, %56 : vector<128x1xf32>
    %59 = vector.broadcast %0 : i32 to vector<128x1xi32>
    %60 = arith.cmpi slt, %7, %59 : vector<128x1xi32>
    %cst_23 = arith.constant 0.000000e+00 : f32
    %61 = vector.broadcast %cst_23 : f32 to vector<128x1xf32>
    %62 = arith.select %60, %58, %61 : vector<128x1xi1>, vector<128x1xf32>
    %63 = vector.shape_cast %62 : vector<128x1xf32> to vector<1x128x1xf32>
    %cst_24 = arith.constant dense<0.000000e+00> : vector<1xf32>
    %64 = vector.multi_reduction <add>, %63, %cst_24 [1, 2] : vector<1x128x1xf32> to vector<1xf32>
    %65 = vector.shape_cast %64 : vector<1xf32> to vector<1x1x1xf32>
    %66 = vector.extract %65[0, 0, 0] : f32 from vector<1x1x1xf32>
    %67 = vector.broadcast %66 : f32 to vector<1x1xf32>
    %68 = arith.sitofp %0 : i32 to f32
    %69 = vector.broadcast %68 : f32 to vector<1x1xf32>
    %70 = arith.divf %67, %69 : vector<1x1xf32>
    %c0_25 = arith.constant 0 : index
    %c0_26 = arith.constant 0 : index
    %71 = vector.load %arg5[%c0_25, %c0_26] : memref<1x1xf32, #tpu.memory_space<vmem>>, vector<1x1xf32>
    tpu.vector_store %arg5[%c0_25, %c0_26], %70 {strides = array<i32>} : memref<1x1xf32, #tpu.memory_space<vmem>>, vector<1x1xf32>,
    return
  }
}

</mosaic_0001>

<bundles_post_ra>
// kernel: _gather_and_contrast.1
= control target key start
LH: loop header
LB: loop body
LE: loop exit
PB: predicated region body
PF: predicated region fallthrough
CT: control target
= control target key end

     0   :  { %v1189_v2 = vmov 0   ;;  %s2277_s0 = inlined_call_operand.<no memory space> [shape: s32[1], index: 0, kind: input, shape index: {}]   ;;  %s2278_s1 = inlined_call_operand.vmem [shape: bf16[128,128], index: 1, kind: input, shape index: {}]   ;;  %s2279_s2 = inlined_call_operand.vmem [shape: bf16[128,128], index: 2, kind: input, shape index: {}]   ;;  %s2280_s3 = inlined_call_operand.vmem [shape: s32[128,1], index: 3, kind: input, shape index: {}]   ;;  %s2281_s4 = inlined_call_operand.vmem [shape: s32[1,128], index: 4, kind: input, shape index: {}]   ;;  %s2282_s5 = inlined_call_operand.hbm [shape: f32[1,1], index: 5, kind: output, shape index: {}]  }
   0x1   :  { %v1051_v0 = vld [vmem:[%s2279_s2] sm:$0xff]   ;;  %v1052_v1 = vld [vmem:[%s2279_s2 + $0x8] sm:$0xff]   ;;  %1050 = vset.pattern.permute.xlu1 %v1189_v2  ;;  %1049 = vset.pattern.permute.xlu0 %v1189_v2  ;;  %v1053_v3 = vld [vmem:[%s2279_s2 + $0x10] sm:$0xff]  }
   0x2   :  { %996 = vmatprep.subr.bf16.mxu0 %v1051_v0  ;;  %1028 = vmatprep.subr.bf16.mxu1 %v1051_v0  ;;  %v1054_v4 = vld [vmem:[%s2279_s2 + $0x18] sm:$0xff]   ;;  %v1059_v5 = vld [vmem:[%s2278_s1] sm:$0xff]   ;;  %v1056_v8 = vld [vmem:[%s2279_s2 + $0x28] sm:$0xff]  }
   0x3   :  { %997 = vmatpush3.bf16.msra.mxu0 %v1051_v0  ;;  %1036 = vmatpush3.bf16.msra.mxu1 %v1051_v0  ;;  %v1060_v6 = vld [vmem:[%s2278_s1 + $0x20] sm:$0xff]   ;;  %v57_v9 = vld [vmem:[%s2280_s3 + $0x8] sm:$0xff]  ;;  %v59_v10 = vld [vmem:[%s2280_s3 + $0x18] sm:$0xff] }
   0x4   :  { %998 = vmatprep.subr.bf16.mxu0 %v1052_v1  ;;  %1029 = vmatprep.subr.bf16.mxu1 %v1052_v1  ;;  %v1055_v7 = vld [vmem:[%s2279_s2 + $0x20] sm:$0xff]   ;;  %v1057_v12 = vld [vmem:[%s2279_s2 + $0x30] sm:$0xff]  }
   0x5   :  { %1012 = vmatprep.mubr.bf16.mxu0 %v1059_v5  ;;  %1020 = vmatprep.mubr.bf16.mxu1 %v1060_v6  ;;  %v56_v11 = vld [vmem:[%s2280_s3] sm:$0xff] }
   0x6   :  { %405 = vperm.xlu1 %1050, %v57_v9  }
   0x7   :  { %999 = vmatpush3.bf16.msra.mxu0 %v1052_v1  ;;  %1037 = vmatpush3.bf16.msra.mxu1 %v1052_v1 }
   0x8   :  { %1000 = vmatprep.subr.bf16.mxu0 %v1053_v3  ;;  %1030 = vmatprep.subr.bf16.mxu1 %v1053_v3 }
   0xb   :  { %1001 = vmatpush3.bf16.msra.mxu0 %v1053_v3  ;;  %1038 = vmatpush3.bf16.msra.mxu1 %v1053_v3 }
   0xc   :  { %1002 = vmatprep.subr.bf16.mxu0 %v1054_v4  ;;  %1031 = vmatprep.subr.bf16.mxu1 %v1054_v4 }
   0xf   :  { %1003 = vmatpush3.bf16.msra.mxu0 %v1054_v4  ;;  %1039 = vmatpush3.bf16.msra.mxu1 %v1054_v4 }
  0x10   :  { %1004 = vmatprep.subr.bf16.mxu0 %v1055_v7  ;;  %1032 = vmatprep.subr.bf16.mxu1 %v1055_v7 }
  0x13   :  { %1005 = vmatpush3.bf16.msra.mxu0 %v1055_v7  ;;  %1040 = vmatpush3.bf16.msra.mxu1 %v1055_v7 }
  0x14   :  { %1006 = vmatprep.subr.bf16.mxu0 %v1056_v8  ;;  %1033 = vmatprep.subr.bf16.mxu1 %v1056_v8 }
  0x15   :  { %11 = vsyncpa [#allocation4], 0  ;;  %411 = vperm.xlu1 %1050, %v59_v10   ;;  %402 = vperm.xlu0 %1049, %v56_v11   ;;  %v61_v13 = vld [vmem:[%s2280_s3 + $0x28] sm:$0xff]  ;;  %v58_v14 = vld [vmem:[%s2280_s3 + $0x10] sm:$0xff]  ;;  %v266_v31 = vlaneseq  ;;  %v1318_v33 = vstv %s2277_s0  ;;  %s943_s8 = scvt.s32.f32 %s2277_s0  ;;  %s1191_s9 = smov [#allocation3]  }
  0x16   :  { %v1058_v15 = vld [vmem:[%s2279_s2 + $0x38] sm:$0xff]   ;;  %v62_v16 = vld [vmem:[%s2280_s3 + $0x30] sm:$0xff]  ;;  %v60_v17 = vld [vmem:[%s2280_s3 + $0x20] sm:$0xff]  ;;  %2334 = vst [vmem:[#allocation6_spill] sm:$0xff] %v1318_v33  ;;  %s955_s10 = sshll.u32 %s1191_s9, 4  ;;  %s956_s10 = int_to_ptr.vmem [resolvable:$true] %s955_s10 }
  0x17   :  { %1007 = vmatpush3.bf16.msra.mxu0 %v1056_v8  ;;  %1041 = vmatpush3.bf16.msra.mxu1 %v1056_v8  ;;  %v1061_v18 = vld [vmem:[%s2278_s1 + $0x8] sm:$0xff]   ;;  %v63_v20 = vld [vmem:[%s2280_s3 + $0x38] sm:$0xff]  ;;  %v1063_v22 = vld [vmem:[%s2278_s1 + $0x10] sm:$0xff]   ;;  %v1313_v32 = vand.u32 127, %v266_v31  ;;  %s1165_s12 = scalar_lea.vmem %s956_s10, 16  ;;  %s1169_s13 = scalar_lea.vmem %s956_s10, 32 }
  0x18   :  { %1008 = vmatprep.subr.bf16.mxu0 %v1057_v12  ;;  %1034 = vmatprep.subr.bf16.mxu1 %v1057_v12  ;;  %v1062_v19 = vld [vmem:[%s2278_s1 + $0x28] sm:$0xff]   ;;  %v1064_v23 = vld [vmem:[%s2278_s1 + $0x30] sm:$0xff]   ;;  %v64_v24 = vld [vmem:[%s2280_s3 + $0x40] sm:$0xff]  ;;  %p1166_p0 = scmp.ne.s32.totalorder %s956_s10, %s1165_s12  ;;  %p1170_p1 = scmp.lt.s32.totalorder %s956_s10, %s956_s10 }
  0x19   :  { %417 = vperm.xlu1 %1050, %v61_v13   ;;  %408 = vperm.xlu0 %1049, %v58_v14   ;;  %v65_v21 = vld [vmem:[%s2280_s3 + $0x48] sm:$0xff]  ;;  %v1065_v25 = vld [vmem:[%s2278_s1 + $0x18] sm:$0xff]   ;;  %v66_v27 = vld [vmem:[%s2280_s3 + $0x50] sm:$0xff]  ;;  %vm1322_vm0 = vcmp.lt.s32.totalorder %v1313_v32, %v1318_v33  ;;  %p1171_p2 = scmp.lt.s32.totalorder %s1169_s13, %s1165_s12 }
  0x1a   :  { %v1066_v26 = vld [vmem:[%s2278_s1 + $0x38] sm:$0xff]   ;;  %v68_v29 = vld [vmem:[%s2280_s3 + $0x60] sm:$0xff]  ;;  %v69_v30 = vld [vmem:[%s2280_s3 + $0x68] sm:$0xff] }
  0x1b   :  { %1009 = vmatpush3.bf16.msra.mxu0 %v1057_v12  ;;  %1042 = vmatpush3.bf16.msra.mxu1 %v1057_v12  ;;  %v67_v28 = vld [vmem:[%s2280_s3 + $0x58] sm:$0xff]  ;;  %p1172_p3 = por %p1171_p2, %p1170_p1 }
  0x1c   :  { %1010 = vmatprep.subr.bf16.mxu0 %v1058_v15  ;;  %1035 = vmatprep.subr.bf16.mxu1 %v1058_v15 }
  0x1d   :  { %420 = vperm.xlu1 %1050, %v62_v16   ;;  %414 = vperm.xlu0 %1049, %v60_v17   ;;  %p1173_p4 = pnand %p1172_p3, %p1166_p0 }
  0x1f   :  { %1011 = vmatpush3.bf16.msra.mxu0 %v1058_v15  ;;  %1043 = vmatpush3.bf16.msra.mxu1 %v1058_v15 }
  0x21   :  { %423 = vperm.xlu1 %1050, %v63_v20   ;;  %429 = vperm.xlu0 %1049, %v65_v21   ;;  %v71_v20 = vld [vmem:[%s2280_s3 + $0x78] sm:$0xff] }
  0x22   :  { %1013 = vmatmul.mubr.bf16.vlgmr.msra.gmra.mrb[0].mxu0 %v1061_v18  ;;  %1021 = vmatmul.mubr.bf16.vlgmr.msra.gmra.mrb[0].mxu1 %v1062_v19  ;;  %v70_v19 = vld [vmem:[%s2280_s3 + $0x70] sm:$0xff] }
  0x23   :  { %1016 = vmatprep.mubr.bf16.mxu0 %v1063_v22  ;;  %1024 = vmatprep.mubr.bf16.mxu1 %v1064_v23 }
  0x25   :  { %426 = vperm.xlu1 %1050, %v64_v24  }
  0x29   :  { %432 = vperm.xlu1 %1050, %v66_v27  }
  0x2a   :  { %1017 = vmatmul.mubr.bf16.gmra.mrb[4].mxu0 %v1065_v25  ;;  %1025 = vmatmul.mubr.bf16.gmra.mrb[4].mxu1 %v1066_v26 }
  0x2d   :  { %435 = vperm.xlu1 %1050, %v67_v28  }
  0x31   :  { %438 = vperm.xlu1 %1050, %v68_v29  }
  0x35   :  { %441 = vperm.xlu1 %1050, %v69_v30  }
  0x85   :  { %v1412_v21 = vpop.permute.xlu1 %405 }
  0x94   :  { %v1414_v22 = vpop.permute.xlu1 %411  ;;  %v1424_v27 = vpop.permute.xlu0 %402 }
  0x98   :  { %v1416_v23 = vpop.permute.xlu1 %417  ;;  %v1428_v29 = vpop.permute.xlu0 %408 }
  0x9c   :  { %v1418_v24 = vpop.permute.xlu1 %420 }
  0xa0   :  { %v1420_v25 = vpop.permute.xlu1 %423 }
  0xa4   :  { %v1422_v26 = vpop.permute.xlu1 %426 }
  0xa8   :  { %v1426_v28 = vpop.permute.xlu1 %432 }
  0xac   :  { %v1430_v30 = vpop.permute.xlu1 %435 }
  0xf5   :  { %v1014_v34 = vpop.f32.mrb[0].mxu0  ;;  %v1022_v35 = vpop.f32.mrb[0].mxu1 }
  0xf6   :  { %v289_v37 = vmul.f32 10.0, %v1014_v34  ;;  %v297_v38 = vmul.f32 10.0, %v1022_v35  ;;  %v203_v39 = vpop.f32.mrb[1].mxu0  ;;  %v235_v40 = vpop.f32.mrb[1].mxu1 }
  0xf7   :  { %v287_v41 = vmul.f32 10.0, %v203_v39  ;;  %v1015_v42 = vpop.f32.mrb[2].mxu0  ;;  %v1023_v43 = vpop.f32.mrb[2].mxu1  ;;  %v295_v51 = vmul.f32 10.0, %v235_v40 }
  0xf8   :  { %v290_v44 = vmul.f32 10.0, %v1015_v42  ;;  %v206_v45 = vpop.f32.mrb[3].mxu0  ;;  %v238_v46 = vpop.f32.mrb[3].mxu1  ;;  %v1328_v47 = vsel %vm1322_vm0, %v297_v38, -1e+30  ;;  %v298_v52 = vmul.f32 10.0, %v1023_v43 }
  0xf9   :  { %341 = vmax.xlane.f32.xlu0 %v1328_v47  ;;  %v1333_v48 = vsel %vm1322_vm0, %v289_v37, -1e+30  ;;  %v1338_v49 = vsel %vm1322_vm0, %v287_v41, -1e+30  ;;  %v288_v59 = vmul.f32 10.0, %v206_v45  ;;  %v296_v61 = vmul.f32 10.0, %v238_v46  ;;  %v1432_v34 = vpop.permute.xlu0 %414  ;;  %v1434_v35 = vpop.permute.xlu1 %438 }
  0xfa   :  { %325 = vmax.xlane.f32.xlu1 %v1333_v48  ;;  %v1342_v50 = vsel %vm1322_vm0, %v290_v44, -1e+30  ;;  %v1348_v60 = vsel %vm1322_vm0, %v295_v51, -1e+30  ;;  %v1353_v62 = vsel %vm1322_vm0, %v298_v52, -1e+30 }
  0xfb   :  { %v1358_v3 = vsel %vm1322_vm0, %v288_v59, -1e+30  ;;  %v1362_v4 = vsel %vm1322_vm0, %v296_v61, -1e+30 }
  0xfd   :  { %321 = vmax.xlane.f32.xlu0 %v1338_v49  ;;  %v1026_v53 = vpop.f32.mrb[4].mxu1  ;;  %v1018_v54 = vpop.f32.mrb[4].mxu0 }
  0xfe   :  { %327 = vmax.xlane.f32.xlu1 %v1342_v50  ;;  %v251_v55 = vpop.f32.mrb[5].mxu1  ;;  %v219_v56 = vpop.f32.mrb[5].mxu0  ;;  %v293_v1 = vmul.f32 10.0, %v1018_v54  ;;  %v301_v2 = vmul.f32 10.0, %v1026_v53 }
  0xff   :  { %v1027_v57 = vpop.f32.mrb[6].mxu1  ;;  %v1019_v58 = vpop.f32.mrb[6].mxu0  ;;  %v291_v6 = vmul.f32 10.0, %v219_v56  ;;  %v299_v7 = vmul.f32 10.0, %v251_v55 }
 0x100   :  { %v254_v63 = vpop.f32.mrb[7].mxu1  ;;  %v222_v0 = vpop.f32.mrb[7].mxu0  ;;  %v1368_v5 = vsel %vm1322_vm0, %v293_v1, -1e+30  ;;  %v1372_v8 = vsel %vm1322_vm0, %v301_v2, -1e+30 }
 0x101   :  { %337 = vmax.xlane.f32.xlu0 %v1348_v60  ;;  %v302_v9 = vmul.f32 10.0, %v1027_v57  ;;  %v1378_v10 = vsel %vm1322_vm0, %v291_v6, -1e+30  ;;  %v1382_v11 = vsel %vm1322_vm0, %v299_v7, -1e+30  ;;  %v294_v12 = vmul.f32 10.0, %v1019_v58  ;;  %v1436_v37 = vpop.permute.xlu0 %429  ;;  %v1438_v38 = vpop.permute.xlu1 %441 }
 0x102   :  { %343 = vmax.xlane.f32.xlu1 %v1353_v62  ;;  %v300_v13 = vmul.f32 10.0, %v254_v63  ;;  %v292_v16 = vmul.f32 10.0, %v222_v0 }
 0x103   :  { %v1388_v14 = vsel %vm1322_vm0, %v302_v9, -1e+30  ;;  %v1392_v15 = vsel %vm1322_vm0, %v294_v12, -1e+30 }
 0x104   :  { %v1398_v17 = vsel %vm1322_vm0, %v300_v13, -1e+30  ;;  %v1402_v18 = vsel %vm1322_vm0, %v292_v16, -1e+30 }
 0x105   :  { %323 = vmax.xlane.f32.xlu0 %v1358_v3 }
 0x106   :  { %339 = vmax.xlane.f32.xlu1 %v1362_v4 }
 0x109   :  { %333 = vmax.xlane.f32.xlu0 %v1368_v5 }
 0x10a   :  { %349 = vmax.xlane.f32.xlu1 %v1372_v8 }
 0x10d   :  { %329 = vmax.xlane.f32.xlu0 %v1378_v10 }
 0x10e   :  { %345 = vmax.xlane.f32.xlu1 %v1382_v11 }
 0x111   :  { %351 = vmax.xlane.f32.xlu0 %v1388_v14 }
 0x112   :  { %335 = vmax.xlane.f32.xlu1 %v1392_v15 }
 0x115   :  { %347 = vmax.xlane.f32.xlu0 %v1398_v17 }
 0x116   :  { %331 = vmax.xlane.f32.xlu1 %v1402_v18 }
 0x127   :  { %444 = vperm.xlu1 %1050, %v70_v19  }
 0x12b   :  { %447 = vperm.xlu0 %1049, %v71_v20  }
 0x186   :  { %v342_v39 = vpop.xlane.xlu0 %341 }
 0x187   :  { %v326_v40 = vpop.xlane.xlu1 %325  ;;  %v1441_v41 = vsub.f32 %v1328_v47, %v342_v39 }
 0x188   :  { %v1444_v42 = vsub.f32 %v1333_v48, %v326_v40 }
 0x189   :  { %v389_v51 = vmul.f32 1.442695, %v1441_v41 }
 0x18a   :  { %v373_v43 = vmul.f32 1.442695, %v1444_v42  ;;  %v322_v44 = vpop.xlane.xlu0 %321 }
 0x18b   :  { %v1448_v45 = vsub.f32 %v1338_v49, %v322_v44  ;;  %v328_v46 = vpop.xlane.xlu1 %327 }
 0x18c   :  { %1067 = vpow2.f32 %v373_v43  ;;  %v1459_v49 = vsub.f32 %v1342_v50, %v328_v46  ;;  %v1478_v50 = vld [vmem:[%s2281_s4] ss:$0 sm:$0xff] }
 0x18d   :  { %v369_v52 = vmul.f32 1.442695, %v1448_v45  ;;  %vm455_vm1 = vcmp.eq.s32.totalorder %v1428_v29, %v1478_v50  ;;  %vm2285_vm2 = vcmp.eq.s32.totalorder %v1426_v28, %v1478_v50  ;;  %vm453_vm3 = vcmp.eq.s32.totalorder %v1424_v27, %v1478_v50 }
 0x18e   :  { %v338_v53 = vpop.xlane.xlu0 %337  ;;  %v375_v59 = vmul.f32 1.442695, %v1459_v49  ;;  %vm2290_vm4 = vcmp.eq.s32.totalorder %v1422_v26, %v1478_v50  ;;  %vm456_vm5 = vcmp.eq.s32.totalorder %v1414_v22, %v1478_v50  ;;  %vm454_vm6 = vcmp.eq.s32.totalorder %v1412_v21, %v1478_v50 }
 0x18f   :  { %1069 = vpow2.f32 %v369_v52  ;;  %v1453_v47 = vsub.f32 %v1348_v60, %v338_v53  ;;  %v1455_v54 = vpop.xlane.xlu1 %343  ;;  %vm2288_vm7 = vcmp.eq.s32.totalorder %v1436_v37, %v1478_v50  ;;  %vm459_vm8 = vcmp.eq.s32.totalorder %v1418_v24, %v1478_v50 }
 0x190   :  { %1071 = vpow2.f32 %v389_v51  ;;  %vm457_vm9 = vcmp.eq.s32.totalorder %v1432_v34, %v1478_v50  ;;  %vm2291_vm10 = vcmp.eq.s32.totalorder %v1420_v25, %v1478_v50  ;;  %vm458_vm11 = vcmp.eq.s32.totalorder %v1416_v23, %v1478_v50 }
 0x191   :  { %v385_v48 = vmul.f32 1.442695, %v1453_v47  ;;  %vm2284_vm12 = vcmp.eq.s32.totalorder %v1430_v30, %v1478_v50  ;;  %vm2283_vm13 = vcmp.eq.s32.totalorder %v1434_v35, %v1478_v50  ;;  %v2358_v22 = vmov 0 }
 0x192   :  { %v324_v56 = vpop.xlane.xlu0 %323 }
 0x193   :  { %1073 = vpow2.f32 %v385_v48  ;;  %v340_v55 = vpop.xlane.xlu1 %339  ;;  %v1468_v60 = vsub.f32 %v1358_v3, %v324_v56 }
 0x194   :  { %1075 = vpow2.f32 %v375_v59  ;;  %v1484_v1 = vsub.f32 %v1362_v4, %v340_v55 }
 0x195   :  { %v371_v2 = vmul.f32 1.442695, %v1468_v60 }
 0x196   :  { %v1461_v57 = vpop.eup %1067  ;;  %v334_v0 = vpop.xlane.xlu0 %333  ;;  %v387_v9 = vmul.f32 1.442695, %v1484_v1 }
 0x197   :  { %v1463_v58 = vpop.xlane.xlu1 %349  ;;  %473 = vadd.xlane.f32.xlu0 %v1461_v57  ;;  %v503_v7 = vsel %vm455_vm1, %v1461_v57, 0.0  ;;  %1077 = vpow2.f32 %v371_v2  ;;  %v1498_v4 = vsub.f32 %v1368_v5, %v334_v0 }
 0x198   :  { %1079 = vpow2.f32 %v387_v9 }
 0x199   :  { %v1470_v61 = vpop.eup %1069  ;;  %v381_v5 = vmul.f32 1.442695, %v1498_v4 }
 0x19a   :  { %v1472_v63 = vpop.eup %1071  ;;  %469 = vadd.xlane.f32.xlu1 %v1470_v61  ;;  %v330_v12 = vpop.xlane.xlu0 %329  ;;  %v501_v16 = vsel %vm453_vm3, %v1470_v61, 0.0 }
 0x19b   :  { %489 = vadd.xlane.f32.xlu0 %v1472_v63  ;;  %v346_v6 = vpop.xlane.xlu1 %345  ;;  %v511_v13 = vsel %vm2285_vm2, %v1472_v63, 0.0  ;;  %v1514_v20 = vsub.f32 %v1378_v10, %v330_v12  ;;  %1081 = vpow2.f32 %v381_v5 }
 0x19d   :  { %v1487_v3 = vpop.eup %1073  ;;  %v377_v43 = vmul.f32 1.442695, %v1514_v20 }
 0x19e   :  { %521 = vadd.xlane.f32.xlu1 %v503_v7  ;;  %v509_v39 = vsel %vm2290_vm4, %v1487_v3, 0.0  ;;  %v1520_v40 = vpop.eup %1075  ;;  %v352_v55 = vpop.xlane.xlu0 %351 }
 0x19f   :  { %485 = vadd.xlane.f32.xlu0 %v1487_v3  ;;  %v336_v19 = vpop.xlane.xlu1 %335  ;;  %v504_v46 = vsel %vm456_vm5, %v1520_v40, 0.0  ;;  %1083 = vpow2.f32 %v377_v43 }
 0x1a0   :  { %v1525_v44 = vsub.f32 %v1392_v15, %v336_v19 }
 0x1a1   :  { %v1533_v51 = vpop.eup %1077 }
 0x1a2   :  { %537 = vadd.xlane.f32.xlu1 %v511_v13  ;;  %v383_v52 = vmul.f32 1.442695, %v1525_v44  ;;  %v502_v53 = vsel %vm454_vm6, %v1533_v51, 0.0  ;;  %v1546_v48 = vpop.eup %1079 }
 0x1a3   :  { %517 = vadd.xlane.f32.xlu0 %v501_v16  ;;  %v332_v10 = vpop.xlane.xlu1 %331  ;;  %v510_v59 = vsel %vm2288_vm7, %v1546_v48, 0.0  ;;  %v1590_v16 = vsub.f32 %v1372_v8, %v1463_v58  ;;  %v1607_v8 = vsub.f32 %v1388_v14, %v352_v55 }
 0x1a4   :  { %v1538_v15 = vsub.f32 %v1402_v18, %v332_v10  ;;  %v1553_v18 = vsub.f32 %v1353_v62, %v1455_v54  ;;  %1085 = vpow2.f32 %v383_v52  ;;  %v1567_v62 = vsub.f32 %v1382_v11, %v346_v6  ;;  %v348_v54 = vpop.xlane.xlu0 %347 }
 0x1a5   :  { %v1560_v0 = vpop.eup %1081  ;;  %v1580_v11 = vsub.f32 %v1398_v17, %v348_v54  ;;  %2339 = vst [vmem:[#allocation9_spill] sm:$0xff] %v1590_v16  ;;  %2340 = vst [vmem:[#allocation10_spill] sm:$0xff] %v1607_v8  ;;  %v399_v10 = vmul.f32 1.442695, %v1607_v8  ;;  %v1626_v52 = vshrl.u32 %v266_v31, 7 }
 0x1a6   :  { %533 = vadd.xlane.f32.xlu1 %v509_v39  ;;  %2337 = vst [vmem:[#allocation7_spill] sm:$0xff] %v1553_v18  ;;  %v379_v56 = vmul.f32 1.442695, %v1538_v15  ;;  %v391_v2 = vmul.f32 1.442695, %v1553_v18  ;;  %v507_v7 = vsel %vm459_vm8, %v1560_v0, 0.0 }
 0x1a7   :  { %475 = vadd.xlane.f32.xlu0 %v1520_v40  ;;  %v393_v12 = vmul.f32 1.442695, %v1567_v62  ;;  %2338 = vst [vmem:[#allocation8_spill] sm:$0xff] %v1580_v11  ;;  %v395_v17 = vmul.f32 1.442695, %v1580_v11  ;;  %v1643_v31 = vadd.s32 8, %v1626_v52  ;;  %vm629_vm15 = vcmp.ne.s32.totalorder %v1626_v52, %v1313_v32 }
 0x1a8   :  { %1087 = vpow2.f32 %v379_v56  ;;  %v397_v39 = vmul.f32 1.442695, %v1590_v16  ;;  %vm1667_vm2 = vmand %vm453_vm3, %vm629_vm15  ;;  %v1685_v27 = vadd.s32 40, %v1626_v52  ;;  %v1711_v21 = vadd.s32 48, %v1626_v52 }
 0x1a9   :  { %v1573_v9 = vpop.eup %1083  ;;  %1089 = vpow2.f32 %v391_v2  ;;  %2341 = vst [vmem:[#allocation11_spill] sm:$0xff] %v1643_v31  ;;  %v1650_v2 = vadd.s32 16, %v1626_v52  ;;  %vm2295_vm15 = vmand %vm1667_vm2, %vm1322_vm0  ;;  %v1726_v29 = vadd.s32 56, %v1626_v52 }
 0x1aa   :  { %523 = vadd.xlane.f32.xlu1 %v504_v46  ;;  %v505_v6 = vsel %vm457_vm9, %v1573_v9, 0.0  ;;  %1091 = vpow2.f32 %v393_v12  ;;  %2347 = vst [vmem:[#allocation15_spill] sm:$0xff] %v1685_v27  ;;  %2352 = vst [vmem:[#allocation16_spill] sm:$0xff] %v1711_v21 }
 0x1ab   :  { %471 = vadd.xlane.f32.xlu0 %v1533_v51  ;;  %1093 = vpow2.f32 %v395_v17  ;;  %2342 = vst [vmem:[#allocation12_spill] sm:$0xff] %v1650_v2  ;;  %v1676_v17 = vpop.permute.xlu0 %447  ;;  %2353 = vst [vmem:[#allocation17_spill] sm:$0xff] %v1726_v29 }
 0x1ac   :  { %1095 = vpow2.f32 %v397_v39 }
 0x1ad   :  { %1097 = vpow2.f32 %v399_v10  ;;  %v1965_v10 = vadd.s32 112, %v1626_v52 }
 0x1ae   :  { %519 = vadd.xlane.f32.xlu1 %v502_v53  ;;  %v1586_v13 = vpop.eup %1085  ;;  %v1628_v53 = vpop.permute.xlu1 %444 }
 0x1af   :  { %487 = vadd.xlane.f32.xlu0 %v1546_v48  ;;  %v508_v19 = vsel %vm2291_vm10, %v1586_v13, 0.0  ;;  %vm2286_vm14 = vcmp.eq.s32.totalorder %v1628_v53, %v1478_v50 }
 0x1b2   :  { %535 = vadd.xlane.f32.xlu1 %v510_v59  ;;  %v1600_v5 = vpop.eup %1087 }
 0x1b3   :  { %481 = vadd.xlane.f32.xlu0 %v1560_v0  ;;  %v506_v58 = vsel %vm458_vm11, %v1600_v5, 0.0  ;;  %v1613_v43 = vpop.eup %1089 }
 0x1b4   :  { %v512_v14 = vsel %vm2284_vm12, %v1613_v43, 0.0  ;;  %v1623_v46 = vpop.eup %1091  ;;  %vm2287_vm12 = vcmp.eq.s32.totalorder %v1438_v38, %v1478_v50 }
 0x1b5   :  { %v513_v55 = vsel %vm2283_vm13, %v1623_v46, 0.0  ;;  %v1637_v56 = vpop.eup %1093  ;;  %vm630_vm13 = vcmp.ne.s32.totalorder %v1643_v31, %v1313_v32 }
 0x1b6   :  { %529 = vadd.xlane.f32.xlu1 %v507_v7  ;;  %v1645_v59 = vpop.eup %1095  ;;  %v1660_v7 = vadd.s32 24, %v1626_v52  ;;  %vm1690_vm3 = vmand %vm454_vm6, %vm630_vm13  ;;  %vm2289_vm6 = vcmp.eq.s32.totalorder %v1676_v17, %v1478_v50 }
 0x1b7   :  { %477 = vadd.xlane.f32.xlu0 %v1573_v9  ;;  %v515_v54 = vsel %vm2286_vm14, %v1645_v59, 0.0  ;;  %vm631_vm14 = vcmp.ne.s32.totalorder %v1650_v2, %v1313_v32  ;;  %v1682_v39 = vpop.eup %1097 }
 0x1b8   :  { %2343 = vst [vmem:[#allocation13_spill] sm:$0xff] %v1660_v7  ;;  %vm1704_vm7 = vmand %vm455_vm1, %vm631_vm14  ;;  %vm634_vm14 = vcmp.ne.s32.totalorder %v1685_v27, %v1313_v32 }
 0x1b9   :  { %vm2294_vm1 = vmand %vm1690_vm3, %vm1322_vm0 }
 0x1ba   :  { %525 = vadd.xlane.f32.xlu1 %v505_v6  ;;  %v1674_v6 = vadd.s32 32, %v1626_v52  ;;  %vm2296_vm4 = vmand %vm1704_vm7, %vm1322_vm0 }
 0x1bb   :  { %483 = vadd.xlane.f32.xlu0 %v1586_v13 }
 0x1bc   :  { %2346 = vst [vmem:[#allocation14_spill] sm:$0xff] %v1674_v6  ;;  %vm633_vm13 = vcmp.ne.s32.totalorder %v1674_v6, %v1313_v32 }
 0x1bd   :  { %vm1748_vm10 = vmand %vm457_vm9, %vm633_vm13  ;;  %vm636_vm9 = vcmp.ne.s32.totalorder %v1726_v29, %v1313_v32 }
 0x1be   :  { %531 = vadd.xlane.f32.xlu1 %v508_v19  ;;  %v514_v19 = vsel %vm2287_vm12, %v1637_v56, 0.0  ;;  %vm632_vm12 = vcmp.ne.s32.totalorder %v1660_v7, %v1313_v32  ;;  %vm2299_vm13 = vmand %vm1748_vm10, %vm1322_vm0 }
 0x1bf   :  { %479 = vadd.xlane.f32.xlu0 %v1600_v5 }
 0x1c2   :  { %527 = vadd.xlane.f32.xlu1 %v506_v58 }
 0x1c3   :  { %491 = vadd.xlane.f32.xlu0 %v1613_v43 }
 0x1c6   :  { %539 = vadd.xlane.f32.xlu1 %v512_v14  ;;  %v516_v14 = vsel %vm2289_vm6, %v1682_v39, 0.0  ;;  %vm1737_vm6 = vmand %vm456_vm5, %vm632_vm12  ;;  %vm635_vm12 = vcmp.ne.s32.totalorder %v1711_v21, %v1313_v32 }
 0x1c7   :  { %493 = vadd.xlane.f32.xlu0 %v1623_v46  ;;  %vm1755_vm5 = vmand %vm458_vm11, %vm634_vm14 }
 0x1c8   :  { %v2359_v22 = vsel %vm1755_vm5, 4294967295, %v2358_v22  ;;  %vm2301_vm11 = vmand %vm1737_vm6, %vm1322_vm0 }
 0x1c9   :  { %vm1789_vm14 = vmand %vm459_vm8, %vm635_vm12  ;;  %vm2367_vm12 = vcmp.eq.s32.totalorder %v1422_v26, %v1478_v50 }
 0x1ca   :  { %541 = vadd.xlane.f32.xlu1 %v513_v55  ;;  %v2325_v55 = vmov 0.0   ;;  %vm2300_vm8 = vmand %vm1755_vm5, %vm1322_vm0 }
 0x1cb   :  { %495 = vadd.xlane.f32.xlu0 %v1637_v56  ;;  %v678_v34 = vsel %vm2294_vm1, 1.0, %v2325_v55  ;;  %v679_v23 = vsel %vm2296_vm4, 1.0, %v2325_v55  ;;  %vm2363_vm1 = vcmp.eq.s32.totalorder %v1420_v25, %v1478_v50  ;;  %v680_v24 = vsel %vm2301_vm11, 1.0, %v2325_v55 }
 0x1cc   :  { %v681_v25 = vsel %vm2299_vm13, 1.0, %v2325_v55 }
 0x1ce   :  { %545 = vadd.xlane.f32.xlu1 %v515_v54  ;;  %v677_v54 = vsel %vm2295_vm15, 1.0, %v2325_v55  ;;  %vm1796_vm15 = vmand %vm2363_vm1, %vm636_vm9 }
 0x1cf   :  { %497 = vadd.xlane.f32.xlu0 %v1645_v59  ;;  %vm2303_vm1 = vmand %vm1789_vm14, %vm1322_vm0 }
 0x1d0   :  { %v683_v26 = vsel %vm2303_vm1, 1.0, %v2325_v55 }
 0x1d2   :  { %543 = vadd.xlane.f32.xlu1 %v514_v19 }
 0x1d3   :  { %499 = vadd.xlane.f32.xlu0 %v1682_v39 }
 0x1d6   :  { %547 = vadd.xlane.f32.xlu1 %v516_v14  ;;  %v1762_v14 = vadd.s32 64, %v1626_v52 }
 0x1d7   :  { %693 = vadd.xlane.f32.xlu0 %v677_v54 }
 0x1d8   :  { %2360 = vst [vmem:[#allocation18_spill] sm:$0xff] %v1762_v14  ;;  %vm637_vm4 = vcmp.ne.s32.totalorder %v1762_v14, %v1313_v32 }
 0x1d9   :  { %vm1828_vm9 = vmand %vm2367_vm12, %vm637_vm4 }
 0x1da   :  { %695 = vadd.xlane.f32.xlu1 %v678_v34  ;;  %vm2307_vm4 = vmand %vm1796_vm15, %vm1322_vm0 }
 0x1db   :  { %697 = vadd.xlane.f32.xlu0 %v679_v23  ;;  %v1803_v23 = vadd.s32 72, %v1626_v52  ;;  %vm2308_vm12 = vmand %vm1828_vm9, %vm1322_vm0 }
 0x1dd   :  { %2366 = vst [vmem:[#allocation19_spill] sm:$0xff] %v1803_v23  ;;  %vm638_vm13 = vcmp.ne.s32.totalorder %v1803_v23, %v1313_v32  ;;  %v2372_v23 = vmov 0 }
 0x1de   :  { %699 = vadd.xlane.f32.xlu1 %v680_v24  ;;  %v1833_v24 = vadd.s32 80, %v1626_v52 }
 0x1df   :  { %701 = vadd.xlane.f32.xlu0 %v681_v25  ;;  %v682_v25 = vsel %vm2300_vm8, 1.0, %v2325_v55  ;;  %vm2371_vm8 = vcmp.eq.s32.totalorder %v1436_v37, %v1478_v50  ;;  %v685_v37 = vsel %vm2308_vm12, 1.0, %v2325_v55 }
 0x1e0   :  { %2370 = vst [vmem:[#allocation20_spill] sm:$0xff] %v1833_v24  ;;  %vm1860_vm11 = vmand %vm2371_vm8, %vm638_vm13  ;;  %vm639_vm1 = vcmp.ne.s32.totalorder %v1833_v24, %v1313_v32  ;;  %vm2376_vm8 = vcmp.eq.s32.totalorder %v1426_v28, %v1478_v50  ;;  %v2380_v28 = vmov 0 }
 0x1e1   :  { %v2373_v23 = vsel %vm1860_vm11, 4294967295, %v2372_v23  ;;  %vm2309_vm13 = vmand %vm1860_vm11, %vm1322_vm0 }
 0x1e2   :  { %703 = vadd.xlane.f32.xlu1 %v682_v25  ;;  %2374 = vst [vmem:[#allocation21_spill] sm:$0xff] %v2373_v23  ;;  %v1867_v25 = vadd.s32 88, %v1626_v52  ;;  %vm1888_vm5 = vmand %vm2376_vm8, %vm639_vm1  ;;  %vm2379_vm1 = vcmp.eq.s32.totalorder %v1430_v30, %v1478_v50 }
 0x1e3   :  { %705 = vadd.xlane.f32.xlu0 %v683_v26  ;;  %v684_v26 = vsel %vm2307_vm4, 1.0, %v2325_v55  ;;  %vm2331_vm12 = vmand %vm1888_vm5, %vm1322_vm0 }
 0x1e4   :  { %2375 = vst [vmem:[#allocation22_spill] sm:$0xff] %v1867_v25  ;;  %vm640_vm4 = vcmp.ne.s32.totalorder %v1867_v25, %v1313_v32 }
 0x1e5   :  { %vm1907_vm8 = vmand %vm2379_vm1, %vm640_vm4 }
 0x1e6   :  { %707 = vadd.xlane.f32.xlu1 %v684_v26  ;;  %v686_v26 = vsel %vm2309_vm13, 1.0, %v2325_v55  ;;  %v2381_v28 = vsel %vm1907_vm8, 4294967295, %v2380_v28  ;;  %vm2330_vm13 = vmand %vm1907_vm8, %vm1322_vm0 }
 0x1e7   :  { %709 = vadd.xlane.f32.xlu0 %v685_v37  ;;  %2382 = vst [vmem:[#allocation23_spill] sm:$0xff] %v2381_v28  ;;  %v687_v37 = vsel %vm2331_vm12, 1.0, %v2325_v55  ;;  %v688_v30 = vsel %vm2330_vm13, 1.0, %v2325_v55  ;;  %vm2383_vm1 = vmand %vm1704_vm7, %vm1322_vm0  ;;  %vm2384_vm13 = vcmp.eq.s32.totalorder %v1434_v35, %v1478_v50 }
 0x1e8   :  { %vm2387_vm7 = vmand %vm1667_vm2, %vm1322_vm0  ;;  %vm643_vm2 = vcmp.ne.s32.totalorder %v1965_v10, %v1313_v32 }
 0x1eb   :  { %711 = vadd.xlane.f32.xlu0 %v686_v26 }
 0x1ef   :  { %713 = vadd.xlane.f32.xlu0 %v687_v37 }
 0x1f3   :  { %715 = vadd.xlane.f32.xlu0 %v688_v30 }
 0x224   :  { %v474_v26 = vpop.xlane.xlu0 %473 }
 0x227   :  { %v470_v25 = vpop.xlane.xlu1 %469 }
 0x228   :  { %v490_v29 = vpop.xlane.xlu0 %489 }
 0x22b   :  { %v522_v21 = vpop.xlane.xlu1 %521 }
 0x22c   :  { %v1927_v6 = vpop.xlane.xlu0 %485  ;;  %v551_v37 = vsub.f32 %v474_v26, %v522_v21  ;;  %v1935_v21 = vadd.s32 96, %v1626_v52 }
 0x22e   :  { %v567_v7 = vadd.f32 %v1461_v57, %v551_v37  ;;  %vm641_vm4 = vcmp.ne.s32.totalorder %v1935_v21, %v1313_v32 }
 0x22f   :  { %v538_v2 = vpop.xlane.xlu1 %537  ;;  %vm1957_vm12 = vmand %vm2384_vm13, %vm641_vm4  ;;  %vm2388_vm4 = vcmp.eq.s32.totalorder %v1438_v38, %v1478_v50 }
 0x230   :  { %1099 = vlog2.f32 %v567_v7  ;;  %v518_v31 = vpop.xlane.xlu0 %517  ;;  %v559_v57 = vsub.f32 %v490_v29, %v538_v2  ;;  %vm2333_vm13 = vmand %vm1957_vm12, %vm1322_vm0 }
 0x231   :  { %v549_v33 = vsub.f32 %v470_v25, %v518_v31 }
 0x233   :  { %v565_v8 = vadd.f32 %v1470_v61, %v549_v33  ;;  %v1931_v11 = vpop.xlane.xlu1 %533 }
 0x234   :  { %v476_v28 = vpop.xlane.xlu0 %475 }
 0x235   :  { %1101 = vlog2.f32 %v565_v8 }
 0x237   :  { %v524_v30 = vpop.xlane.xlu1 %523 }
 0x238   :  { %v472_v55 = vpop.xlane.xlu0 %471  ;;  %v552_v16 = vsub.f32 %v476_v28, %v524_v30  ;;  %v1987_v30 = vadd.s32 120, %v1626_v52 }
 0x23a   :  { %v1100_v18 = vpop.eup %1099  ;;  %v568_v23 = vadd.f32 %v1520_v40, %v552_v16  ;;  %v1944_v40 = vadd.s32 104, %v1626_v52  ;;  %v575_v16 = vadd.f32 %v1472_v63, %v559_v57 }
 0x23b   :  { %v520_v26 = vpop.xlane.xlu1 %519  ;;  %v586_v7 = vmul.f32 0.6931472, %v1100_v18 }
 0x23c   :  { %1103 = vlog2.f32 %v568_v23  ;;  %v1937_v31 = vpop.xlane.xlu0 %487  ;;  %v550_v33 = vsub.f32 %v472_v55, %v520_v26  ;;  %vm642_vm8 = vcmp.ne.s32.totalorder %v1944_v40, %v1313_v32 }
 0x23d   :  { %v615_v61 = vsub.f32 %v1444_v42, %v586_v7 }
 0x23e   :  { %v566_v8 = vadd.f32 %v1533_v51, %v550_v33 }
 0x23f   :  { %v1102_v25 = vpop.eup %1101  ;;  %v1947_v2 = vpop.xlane.xlu1 %535  ;;  %v727_v18 = vsel %vm2383_vm1, %v615_v61, 0.0  ;;  %vm1979_vm1 = vmand %vm2388_vm4, %vm642_vm8  ;;  %v2391_v61 = vmov 0.0  }
 0x240   :  { %1105 = vlog2.f32 %v566_v8  ;;  %v482_v42 = vpop.xlane.xlu0 %481  ;;  %745 = vadd.xlane.f32.xlu1 %v727_v18  ;;  %v582_v51 = vmul.f32 0.6931472, %v1102_v25  ;;  %v689_v38 = vsel %vm2333_vm13, 1.0, %v2391_v61  ;;  %vm644_vm13 = vcmp.ne.s32.totalorder %v1987_v30, %v1313_v32  ;;  %vm2395_vm8 = vmand %vm1737_vm6, %vm1322_vm0 }
 0x241   :  { %1107 = vlog2.f32 %v575_v16  ;;  %v557_v16 = vsub.f32 %v1927_v6, %v1931_v11 }
 0x242   :  { %v613_v63 = vsub.f32 %v1448_v45, %v582_v51 }
 0x243   :  { %v530_v55 = vpop.xlane.xlu1 %529  ;;  %v573_v19 = vadd.f32 %v1487_v3, %v557_v16 }
 0x244   :  { %v478_v23 = vpop.xlane.xlu0 %477  ;;  %v555_v28 = vsub.f32 %v482_v42, %v530_v55  ;;  %v725_v35 = vsel %vm2387_vm7, %v613_v63, 0.0  ;;  %vm2392_vm7 = vcmp.eq.s32.totalorder %v1628_v53, %v1478_v50  ;;  %v558_v55 = vsub.f32 %v1937_v31, %v1947_v2 }
 0x245   :  { %741 = vadd.xlane.f32.xlu0 %v725_v35  ;;  %vm2003_vm4 = vmand %vm2392_vm7, %vm643_vm2 }
 0x246   :  { %v1104_v45 = vpop.eup %1103  ;;  %v571_v12 = vadd.f32 %v1560_v0, %v555_v28  ;;  %vm2396_vm2 = vmand %vm1979_vm1, %vm1322_vm0  ;;  %v574_v58 = vadd.f32 %v1546_v48, %v558_v55 }
 0x247   :  { %v526_v57 = vpop.xlane.xlu1 %525  ;;  %v588_v26 = vmul.f32 0.6931472, %v1104_v45  ;;  %vm675_vm6 = vmand %vm2003_vm4, %vm1322_vm0 }
 0x248   :  { %1109 = vlog2.f32 %v571_v12  ;;  %v484_v7 = vpop.xlane.xlu0 %483  ;;  %v553_v33 = vsub.f32 %v478_v23, %v526_v57  ;;  %v691_v3 = vsel %vm675_vm6, 1.0, %v2391_v61 }
 0x249   :  { %717 = vadd.xlane.f32.xlu0 %v689_v38  ;;  %v616_v0 = vsub.f32 %v1459_v49, %v588_v26 }
 0x24a   :  { %v1106_v8 = vpop.eup %1105  ;;  %v569_v18 = vadd.f32 %v1573_v9, %v553_v33  ;;  %v690_v9 = vsel %vm2396_vm2, 1.0, %v2391_v61  ;;  %vm2400_vm2 = vmand %vm1690_vm3, %vm1322_vm0 }
 0x24b   :  { %v532_v42 = vpop.xlane.xlu1 %531  ;;  %v728_v49 = vsel %vm2395_vm8, %v616_v0, 0.0  ;;  %v584_v53 = vmul.f32 0.6931472, %v1106_v8  ;;  %v1108_v32 = vpop.eup %1107  ;;  %vm2397_vm8 = vcmp.eq.s32.totalorder %v1676_v17, %v1478_v50  ;;  %vm2401_vm3 = vmand %vm1789_vm14, %vm1322_vm0 }
 0x24c   :  { %1111 = vlog2.f32 %v569_v18  ;;  %v480_v51 = vpop.xlane.xlu0 %479  ;;  %v556_v63 = vsub.f32 %v484_v7, %v532_v42  ;;  %747 = vadd.xlane.f32.xlu1 %v728_v49  ;;  %vm2031_vm7 = vmand %vm2397_vm8, %vm644_vm13  ;;  %v602_v31 = vmul.f32 0.6931472, %v1108_v32 }
 0x24d   :  { %719 = vadd.xlane.f32.xlu0 %v690_v9  ;;  %v614_v11 = vsub.f32 %v1468_v60, %v584_v53  ;;  %vm676_vm13 = vmand %vm2031_vm7, %vm1322_vm0 }
 0x24e   :  { %v572_v23 = vadd.f32 %v1586_v13, %v556_v63  ;;  %v692_v26 = vsel %vm676_vm13, 1.0, %v2391_v61  ;;  %v623_v7 = vsub.f32 %v1441_v41, %v602_v31  ;;  %vm2402_vm8 = vmand %vm1888_vm5, %vm1322_vm0 }
 0x24f   :  { %v528_v28 = vpop.xlane.xlu1 %527  ;;  %v726_v60 = vsel %vm2400_vm2, %v614_v11, 0.0  ;;  %vm2403_vm14 = vmand %vm1748_vm10, %vm1322_vm0  ;;  %vm2405_vm10 = vnez %v2359_v22 }
 0x250   :  { %1113 = vlog2.f32 %v572_v23  ;;  %v492_v50 = vpop.xlane.xlu0 %491  ;;  %v554_v17 = vsub.f32 %v480_v51, %v528_v28  ;;  %743 = vadd.xlane.f32.xlu1 %v726_v60  ;;  %v735_v41 = vsel %vm2402_vm8, %v623_v7, 0.0  ;;  %vm2404_vm5 = vmand %vm1796_vm15, %vm1322_vm0  ;;  %v2413_v7 = vld [vmem:[#allocation23_spill] sm:$0xff] }
 0x251   :  { %721 = vadd.xlane.f32.xlu0 %v691_v3  ;;  %1115 = vlog2.f32 %v573_v19  ;;  %vm2406_vm2 = vmand %vm2405_vm10, %vm1322_vm0  ;;  %vm2414_vm8 = vnez %v2413_v7 }
 0x252   :  { %v1110_v13 = vpop.eup %1109  ;;  %v570_v2 = vadd.f32 %v1600_v5, %v554_v17  ;;  %vm2407_vm15 = vmand %vm1828_vm9, %vm1322_vm0 }
 0x253   :  { %v540_v35 = vpop.xlane.xlu1 %539  ;;  %v594_v45 = vmul.f32 0.6931472, %v1110_v13  ;;  %vm2410_vm9 = vmand %vm1957_vm12, %vm1322_vm0 }
 0x254   :  { %1117 = vlog2.f32 %v570_v2  ;;  %v494_v12 = vpop.xlane.xlu0 %493  ;;  %v560_v57 = vsub.f32 %v492_v50, %v540_v35  ;;  %vm2417_vm12 = vmand %vm1979_vm1, %vm1322_vm0  ;;  %v2420_v35 = vld [vmem:[#allocation11_spill] sm:$0xff] }
 0x255   :  { %723 = vadd.xlane.f32.xlu0 %v692_v26  ;;  %v619_v33 = vsub.f32 %v1498_v4, %v594_v45  ;;  %1119 = vlog2.f32 %v574_v58 }
 0x256   :  { %v1112_v48 = vpop.eup %1111  ;;  %v576_v5 = vadd.f32 %v1613_v43, %v560_v57 }
 0x257   :  { %v542_v38 = vpop.xlane.xlu1 %541  ;;  %v731_v0 = vsel %vm2401_vm3, %v619_v33, 0.0  ;;  %v590_v8 = vmul.f32 0.6931472, %v1112_v48  ;;  %vm2409_vm3 = vmand %vm1860_vm11, %vm1322_vm0 }
 0x258   :  { %v496_v16 = vpop.xlane.xlu0 %495  ;;  %v561_v18 = vsub.f32 %v494_v12, %v542_v38  ;;  %753 = vadd.xlane.f32.xlu1 %v731_v0  ;;  %1121 = vlog2.f32 %v576_v5  ;;  %vm2415_vm11 = vmand %vm2414_vm8, %vm1322_vm0  ;;  %v2416_v5 = vld [vmem:[#allocation8_spill] sm:$0xff] }
 0x259   :  { %761 = vadd.xlane.f32.xlu0 %v735_v41  ;;  %v617_v4 = vsub.f32 %v1514_v20, %v590_v8 }
 0x25a   :  { %v1114_v43 = vpop.eup %1113  ;;  %v577_v54 = vadd.f32 %v1623_v46, %v561_v18  ;;  %v2418_v18 = vld [vmem:[#allocation10_spill] sm:$0xff] }
 0x25b   :  { %v546_v61 = vpop.xlane.xlu1 %545  ;;  %v729_v42 = vsel %vm2403_vm14, %v617_v4, 0.0  ;;  %v596_v24 = vmul.f32 0.6931472, %v1114_v43  ;;  %v1116_v49 = vpop.eup %1115 }
 0x25c   :  { %1123 = vlog2.f32 %v577_v54  ;;  %v498_v53 = vpop.xlane.xlu0 %497  ;;  %749 = vadd.xlane.f32.xlu1 %v729_v42  ;;  %v598_v11 = vmul.f32 0.6931472, %v1116_v49 }
 0x25d   :  { %v563_v51 = vsub.f32 %v498_v53, %v546_v61  ;;  %v620_v63 = vsub.f32 %v1525_v44, %v596_v24 }
 0x25e   :  { %v1118_v20 = vpop.eup %1117  ;;  %v621_v34 = vsub.f32 %v1453_v47, %v598_v11 }
 0x25f   :  { %v579_v9 = vadd.f32 %v1645_v59, %v563_v51  ;;  %v544_v32 = vpop.xlane.xlu1 %543  ;;  %v732_v46 = vsel %vm2404_vm5, %v620_v63, 0.0  ;;  %v592_v27 = vmul.f32 0.6931472, %v1118_v20  ;;  %v1120_v19 = vpop.eup %1119  ;;  %vm901_vm5 = vcmask 7168  }
 0x260   :  { %v562_v55 = vsub.f32 %v496_v16, %v544_v32  ;;  %755 = vadd.xlane.f32.xlu1 %v732_v46  ;;  %v500_v28 = vpop.xlane.xlu0 %499  ;;  %v600_v50 = vmul.f32 0.6931472, %v1120_v19 }
 0x261   :  { %1125 = vlog2.f32 %v579_v9  ;;  %v618_v23 = vsub.f32 %v1538_v15, %v592_v27 }
 0x262   :  { %v578_v44 = vadd.f32 %v1637_v56, %v562_v55  ;;  %v1122_v17 = vpop.eup %1121  ;;  %v733_v56 = vsel %vm2407_vm15, %v621_v34, 0.0  ;;  %v622_v22 = vsub.f32 %v1484_v1, %v600_v50  ;;  %v2411_v1 = vld [vmem:[#allocation7_spill] sm:$0xff] }
 0x263   :  { %v548_v60 = vpop.xlane.xlu1 %547  ;;  %v730_v59 = vsel %vm2406_vm2, %v618_v23, 0.0  ;;  %v604_v58 = vmul.f32 0.6931472, %v1122_v17 }
 0x264   :  { %1127 = vlog2.f32 %v578_v44  ;;  %v564_v3 = vsub.f32 %v500_v28, %v548_v60  ;;  %751 = vadd.xlane.f32.xlu1 %v730_v59  ;;  %v694_v4 = vpop.xlane.xlu0 %693 }
 0x265   :  { %v624_v45 = vsub.f32 %v2411_v1, %v604_v58  ;;  %v789_v36 = vmax.f32 %v694_v4, 1.0  ;;  %vm773_vm1 = vcmp.gt.f32.partialorder %v694_v4, 0.0 }
 0x266   :  { %v1124_v31 = vpop.eup %1123  ;;  %v580_v15 = vadd.f32 %v1682_v39, %v564_v3  ;;  %v734_v39 = vsel %vm2409_vm3, %v622_v22, 0.0 }
 0x267   :  { %v606_v13 = vmul.f32 0.6931472, %v1124_v31  ;;  %v736_v33 = vsel %vm2415_vm11, %v624_v45, 0.0  ;;  %v696_v42 = vpop.xlane.xlu1 %695 }
 0x268   :  { %1129 = vlog2.f32 %v580_v15  ;;  %757 = vadd.xlane.f32.xlu1 %v733_v56  ;;  %v698_v43 = vpop.xlane.xlu0 %697  ;;  %v790_v63 = vmax.f32 %v696_v42, 1.0  ;;  %vm774_vm0 = vcmp.gt.f32.partialorder %v696_v42, 0.0 }
 0x269   :  { %v625_v47 = vsub.f32 %v1567_v62, %v606_v13  ;;  %v2412_v62 = vld [vmem:[#allocation9_spill] sm:$0xff]  ;;  %1131 = vrcp.f32 %v789_v36  ;;  %v791_v32 = vmax.f32 %v698_v43, 1.0 }
 0x26a   :  { %1133 = vrcp.f32 %v790_v63 }
 0x26b   :  { %v1126_v2 = vpop.eup %1125  ;;  %v737_v14 = vsel %vm2410_vm9, %v625_v47, 0.0  ;;  %v700_v49 = vpop.xlane.xlu1 %699  ;;  %1135 = vrcp.f32 %v791_v32  ;;  %v2422_v32 = vld [vmem:[#allocation13_spill] sm:$0xff] }
 0x26c   :  { %759 = vadd.xlane.f32.xlu1 %v734_v39  ;;  %765 = vadd.xlane.f32.xlu0 %v737_v14  ;;  %v610_v12 = vmul.f32 0.6931472, %v1126_v2  ;;  %v2139_v54 = vpop.xlane.xlu0 %701  ;;  %v792_v27 = vmax.f32 %v700_v49, 1.0  ;;  %v2419_v2 = vld [vmem:[#allocation6_spill] sm:$0xff]  ;;  %vm776_vm14 = vcmp.gt.f32.partialorder %v700_v49, 0.0 }
 0x26d   :  { %v793_v55 = vmax.f32 %v2139_v54, 1.0  ;;  %vm870_vm4 = vcmp.lt.s32.totalorder %v2420_v35, %v2419_v2  ;;  %vm869_vm7 = vcmp.lt.s32.totalorder %v1626_v52, %v2419_v2  ;;  %vm777_vm10 = vcmp.gt.f32.partialorder %v2139_v54, 0.0  ;;  %v2423_v54 = vld [vmem:[#allocation14_spill] sm:$0xff]  ;;  %v2426_v35 = vld [vmem:[#allocation15_spill] sm:$0xff] }
 0x26e   :  { %v1128_v57 = vpop.eup %1127  ;;  %v627_v26 = vsub.f32 %v2412_v62, %v610_v12  ;;  %1137 = vrcp.f32 %v792_v27  ;;  %vm872_vm2 = vcmp.lt.s32.totalorder %v2422_v32, %v2419_v2  ;;  %vm873_vm15 = vcmp.lt.s32.totalorder %v2423_v54, %v2419_v2 }
 0x26f   :  { %v608_v48 = vmul.f32 0.6931472, %v1128_v57  ;;  %v2149_v6 = vpop.xlane.xlu1 %703  ;;  %1139 = vrcp.f32 %v793_v55 }
 0x270   :  { %763 = vadd.xlane.f32.xlu1 %v736_v33  ;;  %v739_v29 = vsel %vm675_vm6, %v627_v26, 0.0  ;;  %v2141_v37 = vpop.xlane.xlu0 %705  ;;  %v794_v22 = vmax.f32 %v2149_v6, 1.0  ;;  %vm775_vm6 = vcmp.gt.f32.partialorder %v698_v43, 0.0  ;;  %v2421_v26 = vld [vmem:[#allocation12_spill] sm:$0xff]  ;;  %vm778_vm8 = vcmp.gt.f32.partialorder %v2149_v6, 0.0 }
 0x271   :  { %769 = vadd.xlane.f32.xlu0 %v739_v29  ;;  %v626_v38 = vsub.f32 %v2416_v5, %v608_v48  ;;  %v795_v28 = vmax.f32 %v2141_v37, 1.0  ;;  %vm779_vm3 = vcmp.gt.f32.partialorder %v2141_v37, 0.0 }
 0x272   :  { %v1130_v0 = vpop.eup %1129 }
 0x273   :  { %v738_v8 = vsel %vm2417_vm12, %v626_v38, 0.0  ;;  %v612_v16 = vmul.f32 0.6931472, %v1130_v0  ;;  %v2153_v20 = vpop.xlane.xlu1 %707  ;;  %v1132_v23 = vpop.eup %1131  ;;  %1141 = vrcp.f32 %v795_v28 }
 0x274   :  { %767 = vadd.xlane.f32.xlu1 %v738_v8  ;;  %v2143_v61 = vpop.xlane.xlu0 %709  ;;  %v1134_v44 = vpop.eup %1133  ;;  %v796_v17 = vmax.f32 %v2153_v20, 1.0  ;;  %vm780_vm11 = vcmp.gt.f32.partialorder %v2153_v20, 0.0 }
 0x275   :  { %v628_v41 = vsub.f32 %v2418_v18, %v612_v16  ;;  %v1136_v31 = vpop.eup %1135  ;;  %v797_v57 = vmax.f32 %v2143_v61, 1.0 }
 0x276   :  { %1143 = vrcp.f32 %v796_v17 }
 0x277   :  { %v740_v25 = vsel %vm676_vm13, %v628_v41, 0.0  ;;  %1145 = vrcp.f32 %v794_v22  ;;  %vm871_vm13 = vcmp.lt.s32.totalorder %v2421_v26, %v2419_v2 }
 0x278   :  { %771 = vadd.xlane.f32.xlu1 %v740_v25  ;;  %v2145_v24 = vpop.xlane.xlu0 %711  ;;  %v1138_v39 = vpop.eup %1137 }
 0x279   :  { %v1140_v7 = vpop.eup %1139  ;;  %v798_v5 = vmax.f32 %v2145_v24, 1.0 }
 0x27c   :  { %v2147_v53 = vpop.xlane.xlu0 %713 }
 0x27d   :  { %v799_v58 = vmax.f32 %v2147_v53, 1.0  ;;  %v1142_v16 = vpop.eup %1141 }
 0x27f   :  { %1147 = vrcp.f32 %v799_v58 }
 0x280   :  { %v2151_v51 = vpop.xlane.xlu0 %715  ;;  %1149 = vrcp.f32 %v797_v57  ;;  %v1144_v43 = vpop.eup %1143 }
 0x281   :  { %1151 = vrcp.f32 %v798_v5  ;;  %v800_v27 = vmax.f32 %v2151_v51, 1.0 }
 0x2cd   :  { %v746_v46 = vpop.xlane.xlu1 %745 }
 0x2ce   :  { %v810_v15 = vmul.f32 %v1136_v31, %v746_v46 }
 0x2d0   :  { %v839_v45 = vsel %vm775_vm6, %v810_v15, 0.0  ;;  %v2425_v15 = vld [vmem:[#allocation17_spill] sm:$0xff] }
 0x2d1   :  { %v855_v33 = vmul.f32 -1.4285715, %v839_v45  ;;  %vm876_vm12 = vcmp.lt.s32.totalorder %v2425_v15, %v2419_v2 }
 0x2d2   :  { %v742_v9 = vpop.xlane.xlu0 %741 }
 0x2d3   :  { %v806_v59 = vmul.f32 %v1132_v23, %v742_v9  ;;  %v887_v42 = vsel %vm871_vm13, %v855_v33, 0.0  ;;  %vm782_vm13 = vcmp.gt.f32.partialorder %v2145_v24, 0.0 }
 0x2d4   :  { %v905_v55 = vsel %vm901_vm5, %v887_v42, 0.0 }
 0x2d5   :  { %v837_v56 = vsel %vm773_vm1, %v806_v59, 0.0  ;;  %vm781_vm1 = vcmp.gt.f32.partialorder %v2143_v61, 0.0 }
 0x2d6   :  { %v2155_v11 = vpop.xlane.xlu0 %717  ;;  %v853_v14 = vmul.f32 -1.4285715, %v837_v56 }
 0x2d7   :  { %v801_v18 = vmax.f32 %v2155_v11, 1.0 }
 0x2d8   :  { %v885_v48 = vsel %vm869_vm7, %v853_v14, 0.0 }
 0x2d9   :  { %v748_v19 = vpop.xlane.xlu1 %747  ;;  %v902_v41 = vsel %vm901_vm5, %v885_v48, 0.0  ;;  %1153 = vrcp.f32 %v801_v18 }
 0x2da   :  { %v2159_v34 = vpop.xlane.xlu0 %719  ;;  %v812_v12 = vmul.f32 %v1138_v39, %v748_v19  ;;  %v2424_v19 = vld [vmem:[#allocation16_spill] sm:$0xff]  ;;  %1155 = vrcp.f32 %v800_v27 }
 0x2db   :  { %vm875_vm9 = vcmp.lt.s32.totalorder %v2424_v19, %v2419_v2  ;;  %v802_v31 = vmax.f32 %v2159_v34, 1.0 }
 0x2dc   :  { %v840_v38 = vsel %vm776_vm14, %v812_v12, 0.0  ;;  %vm785_vm14 = vcmp.gt.f32.partialorder %v2155_v11, 0.0 }
 0x2dd   :  { %v744_v60 = vpop.xlane.xlu1 %743  ;;  %v856_v49 = vmul.f32 -1.4285715, %v840_v38  ;;  %v2427_v38 = vld [vmem:[#allocation20_spill] sm:$0xff] }
 0x2de   :  { %v808_v50 = vmul.f32 %v1134_v44, %v744_v60  ;;  %v2164_v47 = vpop.xlane.xlu0 %721  ;;  %v1146_v60 = vpop.eup %1145  ;;  %vm879_vm6 = vcmp.lt.s32.totalorder %v2427_v38, %v2419_v2 }
 0x2df   :  { %v803_v23 = vmax.f32 %v2164_v47, 1.0  ;;  %v888_v59 = vsel %vm872_vm2, %v856_v49, 0.0  ;;  %vm881_vm2 = vcmp.lt.s32.totalorder %v1935_v21, %v2419_v2 }
 0x2e0   :  { %v838_v3 = vsel %vm774_vm0, %v808_v50, 0.0  ;;  %vm874_vm0 = vcmp.lt.s32.totalorder %v2426_v35, %v2419_v2  ;;  %v907_v20 = vsel %vm901_vm5, %v888_v59, 0.0 }
 0x2e1   :  { %v854_v13 = vmul.f32 -1.4285715, %v838_v3  ;;  %v1148_v3 = vpop.eup %1147  ;;  %1157 = vrcp.f32 %v803_v23 }
 0x2e2   :  { %v2175_v0 = vpop.xlane.xlu0 %723  ;;  %1159 = vrcp.f32 %v802_v31 }
 0x2e3   :  { %v886_v62 = vsel %vm870_vm4, %v854_v13, 0.0  ;;  %vm783_vm4 = vcmp.gt.f32.partialorder %v2147_v53, 0.0  ;;  %v804_v26 = vmax.f32 %v2175_v0, 1.0 }
 0x2e4   :  { %v903_v52 = vsel %vm901_vm5, %v886_v62, 0.0 }
 0x2e5   :  { %v754_v1 = vpop.xlane.xlu1 %753  ;;  %v904_v36 = vadd.f32 %v903_v52, %v902_v41  ;;  %v2428_v52 = vld [vmem:[#allocation18_spill] sm:$0xff]  ;;  %1161 = vrcp.f32 %v804_v26 }
 0x2e6   :  { %v818_v25 = vmul.f32 %v1142_v16, %v754_v1  ;;  %v762_v44 = vpop.xlane.xlu0 %761  ;;  %v1150_v1 = vpop.eup %1149  ;;  %vm877_vm7 = vcmp.lt.s32.totalorder %v2428_v52, %v2419_v2 }
 0x2e7   :  { %v906_v50 = vadd.f32 %v905_v55, %v904_v36  ;;  %v826_v13 = vmul.f32 %v1148_v3, %v762_v44  ;;  %v1152_v5 = vpop.eup %1151 }
 0x2e8   :  { %v843_v28 = vsel %vm779_vm3, %v818_v25, 0.0  ;;  %v1154_v16 = vpop.eup %1153  ;;  %vm787_vm3 = vcmp.gt.f32.partialorder %v2164_v47, 0.0 }
 0x2e9   :  { %v750_v29 = vpop.xlane.xlu1 %749  ;;  %v859_v58 = vmul.f32 -1.4285715, %v843_v28  ;;  %v908_v45 = vadd.f32 %v907_v20, %v906_v50  ;;  %v847_v33 = vsel %vm783_vm4, %v826_v13, 0.0  ;;  %v1156_v19 = vpop.eup %1155 }
 0x2ea   :  { %v814_v8 = vmul.f32 %v1140_v7, %v750_v29  ;;  %v863_v42 = vmul.f32 -1.4285715, %v847_v33 }
 0x2eb   :  { %v891_v48 = vsel %vm875_vm9, %v859_v58, 0.0  ;;  %v1158_v44 = vpop.eup %1157 }
 0x2ec   :  { %v841_v4 = vsel %vm777_vm10, %v814_v8, 0.0  ;;  %v913_v49 = vsel %vm901_vm5, %v891_v48, 0.0  ;;  %v895_v28 = vsel %vm879_vm6, %v863_v42, 0.0  ;;  %v1160_v31 = vpop.eup %1159 }
 0x2ed   :  { %v857_v63 = vmul.f32 -1.4285715, %v841_v4  ;;  %v756_v9 = vpop.xlane.xlu1 %755  ;;  %v921_v20 = vsel %vm901_vm5, %v895_v28, 0.0 }
 0x2ee   :  { %v820_v46 = vmul.f32 %v1144_v43, %v756_v9 }
 0x2ef   :  { %v889_v37 = vsel %vm873_vm15, %v857_v63, 0.0  ;;  %vm784_vm15 = vcmp.gt.f32.partialorder %v2151_v51, 0.0 }
 0x2f0   :  { %v844_v56 = vsel %vm780_vm11, %v820_v46, 0.0  ;;  %v909_v39 = vsel %vm901_vm5, %v889_v37, 0.0  ;;  %v2429_v46 = vld [vmem:[#allocation19_spill] sm:$0xff]  ;;  %vm883_vm11 = vcmp.lt.s32.totalorder %v1965_v10, %v2419_v2 }
 0x2f1   :  { %v752_v17 = vpop.xlane.xlu1 %751  ;;  %v860_v12 = vmul.f32 -1.4285715, %v844_v56  ;;  %v910_v6 = vadd.f32 %v909_v39, %v908_v45  ;;  %vm878_vm10 = vcmp.lt.s32.totalorder %v2429_v46, %v2419_v2  ;;  %v2430_v56 = vld [vmem:[#allocation22_spill] sm:$0xff] }
 0x2f2   :  { %v816_v22 = vmul.f32 %v1146_v60, %v752_v17  ;;  %vm880_vm9 = vcmp.lt.s32.totalorder %v2430_v56, %v2419_v2 }
 0x2f3   :  { %v892_v18 = vsel %vm876_vm12, %v860_v12, 0.0  ;;  %vm882_vm12 = vcmp.lt.s32.totalorder %v1944_v40, %v2419_v2 }
 0x2f4   :  { %v842_v14 = vsel %vm778_vm8, %v816_v22, 0.0  ;;  %v915_v32 = vsel %vm901_vm5, %v892_v18, 0.0  ;;  %vm786_vm8 = vcmp.gt.f32.partialorder %v2159_v34, 0.0  ;;  %v1162_v34 = vpop.eup %1161 }
 0x2f5   :  { %v858_v57 = vmul.f32 -1.4285715, %v842_v14  ;;  %v758_v62 = vpop.xlane.xlu1 %757 }
 0x2f6   :  { %v822_v7 = vmul.f32 %v1150_v1, %v758_v62 }
 0x2f7   :  { %v890_v29 = vsel %vm874_vm0, %v858_v57, 0.0  ;;  %vm788_vm0 = vcmp.gt.f32.partialorder %v2175_v0, 0.0 }
 0x2f8   :  { %v911_v53 = vsel %vm901_vm5, %v890_v29, 0.0  ;;  %v845_v8 = vsel %vm781_vm1, %v822_v7, 0.0  ;;  %vm884_vm1 = vcmp.lt.s32.totalorder %v1987_v30, %v2419_v2  ;;  %v944_v30 = vstv %s943_s8 }
 0x2f9   :  { %v912_v41 = vadd.f32 %v911_v53, %v910_v6  ;;  %v861_v25 = vmul.f32 -1.4285715, %v845_v8  ;;  %v766_v4 = vpop.xlane.xlu0 %765  ;;  %v760_v43 = vpop.xlane.xlu1 %759  ;;  %1163 = vrcp.f32 %v944_v30 }
 0x2fa   :  { %v830_v36 = vmul.f32 %v1154_v16, %v766_v4  ;;  %v824_v63 = vmul.f32 %v1152_v5, %v760_v43 }
 0x2fb   :  { %v914_v61 = vadd.f32 %v913_v49, %v912_v41  ;;  %v893_v9 = vsel %vm877_vm7, %v861_v25, 0.0 }
 0x2fc   :  { %v849_v54 = vsel %vm785_vm14, %v830_v36, 0.0  ;;  %v846_v27 = vsel %vm782_vm13, %v824_v63, 0.0  ;;  %v917_v60 = vsel %vm901_vm5, %v893_v9, 0.0 }
 0x2fd   :  { %v916_v55 = vadd.f32 %v915_v32, %v914_v61  ;;  %v862_v11 = vmul.f32 -1.4285715, %v846_v27  ;;  %v764_v23 = vpop.xlane.xlu1 %763  ;;  %v865_v37 = vmul.f32 -1.4285715, %v849_v54 }
 0x2fe   :  { %v770_v59 = vpop.xlane.xlu0 %769  ;;  %v828_v50 = vmul.f32 %v1156_v19, %v764_v23 }
 0x2ff   :  { %v918_v24 = vadd.f32 %v917_v60, %v916_v55  ;;  %v894_v17 = vsel %vm878_vm10, %v862_v11, 0.0  ;;  %v834_v3 = vmul.f32 %v1158_v44, %v770_v59  ;;  %v897_v14 = vsel %vm881_vm2, %v865_v37, 0.0 }
 0x300   :  { %v919_v15 = vsel %vm901_vm5, %v894_v17, 0.0  ;;  %v848_v51 = vsel %vm784_vm15, %v828_v50, 0.0  ;;  %v925_v33 = vsel %vm901_vm5, %v897_v14, 0.0 }
 0x301   :  { %v920_v22 = vadd.f32 %v919_v15, %v918_v24  ;;  %v851_v13 = vsel %vm787_vm3, %v834_v3, 0.0  ;;  %v864_v58 = vmul.f32 -1.4285715, %v848_v51  ;;  %v768_v35 = vpop.xlane.xlu1 %767 }
 0x302   :  { %v832_v39 = vmul.f32 %v1160_v31, %v768_v35  ;;  %v867_v47 = vmul.f32 -1.4285715, %v851_v13 }
 0x303   :  { %v922_v1 = vadd.f32 %v921_v20, %v920_v22  ;;  %v896_v45 = vsel %vm880_vm9, %v864_v58, 0.0  ;;  %v1164_v2 = vpop.eup %1163 }
 0x304   :  { %v923_v12 = vsel %vm901_vm5, %v896_v45, 0.0  ;;  %v850_v57 = vsel %vm786_vm8, %v832_v39, 0.0  ;;  %v899_v48 = vsel %vm883_vm11, %v867_v47, 0.0 }
 0x305   :  { %v924_v62 = vadd.f32 %v923_v12, %v922_v1  ;;  %v866_v26 = vmul.f32 -1.4285715, %v850_v57  ;;  %v772_v7 = vpop.xlane.xlu1 %771  ;;  %v929_v53 = vsel %vm901_vm5, %v899_v48, 0.0 }
 0x306   :  { %v836_v21 = vmul.f32 %v1162_v34, %v772_v7 }
 0x307   :  { %v898_v6 = vsel %vm882_vm12, %v866_v26, 0.0  ;;  %v926_v29 = vadd.f32 %v925_v33, %v924_v62 }
 0x308   :  { %v927_v10 = vsel %vm901_vm5, %v898_v6, 0.0  ;;  %v852_v5 = vsel %vm788_vm0, %v836_v21, 0.0 }
 0x309   :  { %v868_v40 = vmul.f32 -1.4285715, %v852_v5  ;;  %v928_v38 = vadd.f32 %v927_v10, %v926_v29 }
 0x30b   :  { %v900_v52 = vsel %vm884_vm1, %v868_v40, 0.0  ;;  %v930_v8 = vadd.f32 %v929_v53, %v928_v38 }
 0x30c   :  { %v931_v16 = vsel %vm901_vm5, %v900_v52, 0.0  ;;  %vm947_vm5 = vcmask 0  }
 0x30d   :  { %v932_v18 = vadd.f32 %v931_v16, %v930_v8 }
 0x30f   :  { %933 = vadd.xlane.f32.xlu0 %v932_v18 }
 0x39c   :  { %v934_v0 = vpop.xlane.xlu0 %933 }
 0x39d   :  { %v935_v41 = vrot.slane %v934_v0, 4 }
 0x39f   :  { %v936_v25 = vadd.f32 %v935_v41, %v934_v0 }
 0x3a1   :  { %v937_v4 = vrot.slane %v936_v25, 2 }
 0x3a3   :  { %v938_v43 = vadd.f32 %v937_v4, %v936_v25 }
 0x3a5   :  { %v939_v42 = vrot.slane %v938_v43, 1 }
 0x3a7   :  { %v940_v49 = vadd.f32 %v939_v42, %v938_v43 }
 0x3a9   :  { %1044 = vpush %v940_v49 }
 0x3da   :  { %s1045_s11 = spop %1044 }
 0x3db   :  { %v942_v36 = vstv %s1045_s11 }
 0x3dc   :  { %v946_v63 = vmul.f32 %v1164_v2, %v942_v36 }
 0x3de   :  { %948 = vst.msk [vmem:[#allocation3] sm:$0x1] %vm947_vm5, %v946_v63 }
 0x3df   :  { %1176 = shalt.err (!%p1173_p4)
}
 0x3e0   :  { %s1177_s15 = scalar_lea.hbm %s2282_s5, 16 }
 0x3e1   :  { %p1178_p5 = scmp.ne.s32.totalorder %s2282_s5, %s1177_s15  ;;  %p1181_p6 = scmp.lt.u32.totalorder %s1177_s15, %s2282_s5 }
 0x3e3   :  { %p1183_p7 = pnand %p1181_p6, %p1178_p5 }
 0x3e5   :  { %1186 = shalt.err (!%p1183_p7)
}
 0x3e6   :  { %958 = dma.vmem_to_hbm [thread:$0]  %s956_s10, 16, %s2282_s5, [#allocation4]  }
 0x3e7   :  { %1187 = dma.done.wait [#allocation4], 16  }
 0x3e8   :  { %1188 = vsyncadd [#allocation4], 4294967280 }
 0x3e9   :  { %962 = vsyncpa [#allocation4], 1 }

</bundles_post_ra>
